<compile_context>
chip_gen: v7x
topology: tpu7x:2x2x1
jax: 0.10.0
libtpu: 0.0.40
codegen_flags: <defaults>
</compile_context>

<pallas_src>
import functools

import jax
import jax.numpy as jnp
from jax.experimental import pallas as pl
from jax.experimental.pallas import tpu as pltpu


def _round_up(x, m):
    return (x + m - 1) // m * m


def _pick_chunk(T, target):
    """Largest divisor of T that is <= target (time steps per grid iteration)."""
    tc = min(T, target)
    while T % tc:
        tc -= 1
    return tc


def _pick_tile(n, target, step):
    """Largest multiple of `step` that divides n and is <= target."""
    if n <= step:
        return n
    t = min(target, n)
    t -= t % step
    while n % t:
        t -= step
    return t


# ----------------------------------------------------------------------------
# Recurrent GRU scan kernel.
#   x:         (T, B, E)  layer input (f32; cast to bf16 at the dot)
#   ctx_gates: (B, 3H)    time-invariant context gate terms (zeros if no ctx)
#   h0:        (B, H)     initial hidden state
#   w_ih:      (E, 3H)    fused input weights  [r|z|n]   (bf16)
#   w_hh:      (H, 3H)    fused hidden weights [r|z|n]   (bf16)
#   b_ih/b_hh: (1, 3H)    fused biases (f32)
# Returns (T, B, H) f32 outputs; the final hidden state is outputs[-1].
# ----------------------------------------------------------------------------
def gru_scan(x, ctx_gates, h0, w_ih, w_hh, b_ih, b_hh, *, t_chunk=16, unroll=8):
    T, B, E = x.shape
    H = h0.shape[-1]
    Tc = _pick_chunk(T, t_chunk)
    unroll = max(1, min(unroll, Tc))

    def kernel(x_ref, cg_ref, h0_ref, wih_ref, whh_ref, bih_ref, bhh_ref,
               out_ref, h_scr):
        @pl.when(pl.program_id(0) == 0)
        def _():
            h_scr[...] = h0_ref[...]

        wih = wih_ref[...]                       # (E, 3H) bf16, VMEM-resident
        whh = whh_ref[...]                       # (H, 3H) bf16
        # Fold all time-invariant add terms once (context gates + input bias).
        add = cg_ref[...] + bih_ref[...]         # (B, 3H) f32
        bhh = bhh_ref[...]                       # (1, 3H) f32

        def step(t, h):
            # One fused input projection + one fused hidden projection per step
            # (PyTorch gate order r, z, n; b_hn stays inside r * (...)).
            x_t = x_ref[t].astype(jnp.bfloat16)                     # (B, E)
            gi = jnp.dot(x_t, wih,
                         preferred_element_type=jnp.float32) + add  # (B, 3H)
            gh = jnp.dot(h.astype(jnp.bfloat16), whh,
                         preferred_element_type=jnp.float32) + bhh  # (B, 3H)
            r = jax.nn.sigmoid(gi[:, :H] + gh[:, :H])
            z = jax.nn.sigmoid(gi[:, H:2 * H] + gh[:, H:2 * H])
            n = jnp.tanh(gi[:, 2 * H:] + r * gh[:, 2 * H:])
            h_new = (1.0 - z) * n + z * h
            out_ref[t] = h_new
            return h_new

        h_scr[...] = jax.lax.fori_loop(0, Tc, step, h_scr[...], unroll=unroll)

    return pl.pallas_call(
        kernel,
        out_shape=jax.ShapeDtypeStruct((T, B, H), jnp.float32),
        grid_spec=pltpu.PrefetchScalarGridSpec(
            num_scalar_prefetch=0,
            grid=(T // Tc,),
            in_specs=[
                pl.BlockSpec((Tc, B, E), lambda c: (c, 0, 0)),
                # Constant-index blocks below (weights / biases / ctx / h0).
                # TODO(synk): pipeline_mode=pl.Buffered(1) here on v7x (64 MiB VMEM).
                pl.BlockSpec((B, 3 * H), lambda c: (0, 0)),
                pl.BlockSpec((B, H), lambda c: (0, 0)),
                pl.BlockSpec((E, 3 * H), lambda c: (0, 0)),
                pl.BlockSpec((H, 3 * H), lambda c: (0, 0)),
                pl.BlockSpec((1, 3 * H), lambda c: (0, 0)),
                pl.BlockSpec((1, 3 * H), lambda c: (0, 0)),
            ],
            out_specs=pl.BlockSpec((Tc, B, H), lambda c: (c, 0, 0)),
            scratch_shapes=[pltpu.VMEM((B, H), jnp.float32)],
        ),
        compiler_params=pltpu.CompilerParams(
            dimension_semantics=("arbitrary",)),
    )(x, ctx_gates, h0, w_ih, w_hh, b_ih, b_hh)


def run_gru(x, h0_layers, layer_params, ctx=None):
    """Multi-layer GRU (dropout=0).  x: (T,B,I); h0_layers: (L,B,H).
    ctx (decoder only): (B,H) encoder context appended to layer-0 input."""
    T, B, _ = x.shape
    H = h0_layers.shape[-1]
    zeros_cg = jnp.zeros((B, 3 * H), jnp.float32)

    hTs = []
    inp = x
    for l, p in enumerate(layer_params):
        if l == 0 and ctx is not None and p["w_ih_ctx"] is not None:
            # Tiny time-invariant matmul: plain jnp.dot (no pallas_call launch).
            cg = jnp.dot(ctx, p["w_ih_ctx"].astype(jnp.float32))
        else:
            cg = zeros_cg
        out = gru_scan(inp, cg, h0_layers[l], p["w_ih"], p["w_hh"],
                       p["b_ih"], p["b_hh"])
        hTs.append(out[-1])          # final hidden state == last output
        inp = out
    return inp, jnp.stack(hTs, axis=0)


# ----------------------------------------------------------------------------
# Tiled dense (Linear) kernel: row x lane-dense column tiles.  The weight and
# bias are pre-padded (N multiple of 128) at parameter-build time.
# ----------------------------------------------------------------------------
def _matmul_bias_kernel(x_ref, w_ref, b_ref, o_ref):
    o_ref[...] = (jnp.dot(x_ref[...].astype(jnp.bfloat16), w_ref[...],
                          preferred_element_type=jnp.float32)
                  + b_ref[...]).astype(o_ref.dtype)


def matmul_bias(x, w, b, *, tm=256, tn=1024):
    """x: (M,K) f32; w: (K,N) bf16 pre-padded; b: (1,N) f32 -> (M,N) f32."""
    M, K = x.shape
    N = w.shape[1]
    tn = _pick_tile(N, tn, 128)
    tm = min(tm, _round_up(M, 8))
    Mp = _round_up(M, tm)
    xp = jnp.pad(x, ((0, Mp - M), (0, 0))) if Mp != M else x

    out = pl.pallas_call(
        _matmul_bias_kernel,
        out_shape=jax.ShapeDtypeStruct((Mp, N), jnp.float32),
        grid_spec=pltpu.PrefetchScalarGridSpec(
            num_scalar_prefetch=0,
            grid=(Mp // tm, N // tn),
            in_specs=[
                pl.BlockSpec((tm, K), lambda i, j: (i, 0)),
                pl.BlockSpec((K, tn), lambda i, j: (0, j)),
                pl.BlockSpec((1, tn), lambda i, j: (0, j)),
            ],
            out_specs=pl.BlockSpec((tm, tn), lambda i, j: (i, j)),
        ),
        compiler_params=pltpu.CompilerParams(
            dimension_semantics=("parallel", "parallel")),
    )(xp, w, b)
    return out[:M] if Mp != M else out


# ----------------------------------------------------------------------------
# Parameter construction (deterministic, synthetic — mirrors module __init__).
# Weights feeding the MXU are stored in bf16; biases / embeddings stay f32.
# ----------------------------------------------------------------------------
def xavier(key, shape):
    fan_in, fan_out = shape
    limit = (6.0 / (fan_in + fan_out)) ** 0.5
    return jax.random.uniform(key, shape, jnp.float32, -limit, limit)


def make_gru_params(key, input_size, hidden_size, num_layers, ctx_size=0):
    H = hidden_size
    params = []
    for l in range(num_layers):
        in_sz = (input_size + ctx_size) if l == 0 else H
        k1, k2, key = jax.random.split(key, 3)
        w_ih = xavier(k1, (in_sz, 3 * H))   # transposed vs PyTorch: (in, 3H)
        w_hh = xavier(k2, (H, 3 * H))
        p = {
            "w_hh": w_hh.astype(jnp.bfloat16),
            "b_ih": jnp.zeros((1, 3 * H), jnp.float32),
            "b_hh": jnp.zeros((1, 3 * H), jnp.float32),
        }
        if l == 0 and ctx_size > 0:
            # Split the layer-0 input weight rows once, at build time:
            # [embedding part ; context part].  The context contribution is
            # time-invariant and handled in the wrapper.
            p["w_ih"] = w_ih[:input_size].astype(jnp.bfloat16)
            p["w_ih_ctx"] = w_ih[input_size:].astype(jnp.bfloat16)
        else:
            p["w_ih"] = w_ih.astype(jnp.bfloat16)
            p["w_ih_ctx"] = None
        params.append(p)
    return params


def make_model_params(key, src_vocab, tgt_vocab, embed_size, num_hiddens,
                      num_layers):
    keys = jax.random.split(key, 5)
    # Pre-pad the output projection to a lane-dense width ONCE (no per-call pad).
    vp = _round_up(tgt_vocab, 128)
    dense_w = xavier(keys[4], (num_hiddens, tgt_vocab))
    dense_w = jnp.pad(dense_w, ((0, 0), (0, vp - tgt_vocab)))
    return {
        "enc_embed": 0.1 * jax.random.normal(keys[0], (src_vocab, embed_size),
                                             jnp.float32),
        "dec_embed": 0.1 * jax.random.normal(keys[1], (tgt_vocab, embed_size),
                                             jnp.float32),
        "enc_gru": make_gru_params(keys[2], embed_size, num_hiddens,
                                   num_layers),
        "dec_gru": make_gru_params(keys[3], embed_size, num_hiddens,
                                   num_layers, ctx_size=num_hiddens),
        "dense_w": dense_w.astype(jnp.bfloat16),
        "dense_b": jnp.zeros((1, vp), jnp.float32),
    }


# ----------------------------------------------------------------------------
# EncoderDecoder forward (matches the PyTorch module's forward, dropout=0).
# ----------------------------------------------------------------------------
@functools.partial(jax.jit, static_argnames=("tgt_vocab",))
def encoder_decoder_forward(params, enc_x, dec_x, *, tgt_vocab):
    B, T_src = enc_x.shape
    _, T_tgt = dec_x.shape
    L = len(params["enc_gru"])
    H = params["enc_gru"][0]["w_hh"].shape[0]

    # ---- Encoder ----  (embedding gather is glue: plain JAX)
    enc_embs = jnp.take(params["enc_embed"], enc_x.T, axis=0)   # (T_src, B, E)
    h0 = jnp.zeros((L, B, H), jnp.float32)
    enc_outputs, enc_state = run_gru(enc_embs, h0, params["enc_gru"])

    # ---- Decoder ----  (no broadcast/concat of the context; folded in-kernel)
    dec_embs = jnp.take(params["dec_embed"], dec_x.T, axis=0)   # (T_tgt, B, E)
    context = enc_outputs[-1]                                    # (B, H)
    dec_outputs, _ = run_gru(dec_embs, enc_state, params["dec_gru"],
                             ctx=context)

    # Transpose the SMALL (T,B,H) tensor so the big logits come out batch-major.
    dec_bm = jnp.swapaxes(dec_outputs, 0, 1).reshape(B * T_tgt, H)
    logits = matmul_bias(dec_bm, params["dense_w"], params["dense_b"])
    return logits[:, :tgt_vocab].reshape(B, T_tgt, tgt_vocab)    # (B, T_tgt, V)


if __name__ == "__main__":
    batch = 4
    src_seq = 8
    tgt_seq = 8
    embed_size = 16
    num_hiddens = 32
    num_layers = 2
    src_vocab = 40
    tgt_vocab = 48

    key = jax.random.PRNGKey(0)
    kp, ke, kd = jax.random.split(key, 3)
    params = make_model_params(kp, src_vocab, tgt_vocab, embed_size,
                               num_hiddens, num_layers)
    enc_x = jax.random.randint(ke, (batch, src_seq), 0, src_vocab, jnp.int32)
    dec_x = jax.random.randint(kd, (batch, tgt_seq), 0, tgt_vocab, jnp.int32)

    out = encoder_decoder_forward(params, enc_x, dec_x, tgt_vocab=tgt_vocab)
    jax.block_until_ready(out)
    assert out.shape == (batch, tgt_seq, tgt_vocab), out.shape
    assert out.dtype == jnp.float32
    print("KERNEL_OK")
</pallas_src>

<mosaic_0001>
module attributes {stable_mosaic.version = 11 : i64} {
  func.func @kernel(%arg0: i32, %arg1: memref<8x4x32xf32, #tpu.memory_space<vmem>>, %arg2: memref<4x96xf32, #tpu.memory_space<vmem>>, %arg3: memref<4x32xf32, #tpu.memory_space<vmem>>, %arg4: memref<32x96xbf16, #tpu.memory_space<vmem>>, %arg5: memref<32x96xbf16, #tpu.memory_space<vmem>>, %arg6: memref<1x96xf32, #tpu.memory_space<vmem>>, %arg7: memref<1x96xf32, #tpu.memory_space<vmem>>, %arg8: memref<8x4x32xf32, #tpu.memory_space<vmem>>, %arg9: memref<4x32xf32, #tpu.memory_space<vmem>>) attributes {dimension_semantics = [#tpu.dimension_semantics<arbitrary>], iteration_bounds = array<i64: 1>, scalar_prefetch = 0 : i64, scratch_operands = 1 : i64, tpu.core_type = #tpu.core_type<tc>, window_params = [{transform_indices = @transform_0, window_bounds = array<i64: 8, 4, 32>}, {pipeline_mode = #tpu.pipeline_mode<synchronous>, transform_indices = @transform_1, window_bounds = array<i64: 4, 96>}, {pipeline_mode = #tpu.pipeline_mode<synchronous>, transform_indices = @transform_2, window_bounds = array<i64: 4, 32>}, {pipeline_mode = #tpu.pipeline_mode<synchronous>, transform_indices = @transform_3, window_bounds = array<i64: 32, 96>}, {pipeline_mode = #tpu.pipeline_mode<synchronous>, transform_indices = @transform_4, window_bounds = array<i64: 32, 96>}, {pipeline_mode = #tpu.pipeline_mode<synchronous>, transform_indices = @transform_5, window_bounds = array<i64: 1, 96>}, {pipeline_mode = #tpu.pipeline_mode<synchronous>, transform_indices = @transform_6, window_bounds = array<i64: 1, 96>}, {transform_indices = @transform_7, window_bounds = array<i64: 8, 4, 32>}]} {
    %c0_i32 = arith.constant 0 : i32
    %0 = arith.cmpi eq, %arg0, %c0_i32 : i32
    %1 = arith.extui %0 : i1 to i32
    %c0_i32_0 = arith.constant 0 : i32
    %2 = arith.cmpi ne, %1, %c0_i32_0 : i32
    scf.if %2 {
      %c0_86 = arith.constant 0 : index
      %c0_87 = arith.constant 0 : index
      %332 = vector.load %arg3[%c0_86, %c0_87] : memref<4x32xf32, #tpu.memory_space<vmem>>, vector<4x32xf32>
      %c0_88 = arith.constant 0 : index
      %c0_89 = arith.constant 0 : index
      %333 = vector.load %arg9[%c0_88, %c0_89] : memref<4x32xf32, #tpu.memory_space<vmem>>, vector<4x32xf32>
      tpu.vector_store %arg9[%c0_88, %c0_89], %332 {strides = array<i32>} : memref<4x32xf32, #tpu.memory_space<vmem>>, vector<4x32xf32>,
    } else {
    }
    %c0 = arith.constant 0 : index
    %c0_1 = arith.constant 0 : index
    %3 = vector.load %arg4[%c0, %c0_1] : memref<32x96xbf16, #tpu.memory_space<vmem>>, vector<32x96xbf16>
    %c0_2 = arith.constant 0 : index
    %c0_3 = arith.constant 0 : index
    %4 = vector.load %arg5[%c0_2, %c0_3] : memref<32x96xbf16, #tpu.memory_space<vmem>>, vector<32x96xbf16>
    %c0_4 = arith.constant 0 : index
    %c0_5 = arith.constant 0 : index
    %5 = vector.load %arg2[%c0_4, %c0_5] : memref<4x96xf32, #tpu.memory_space<vmem>>, vector<4x96xf32>
    %c0_6 = arith.constant 0 : index
    %c0_7 = arith.constant 0 : index
    %6 = vector.load %arg6[%c0_6, %c0_7] : memref<1x96xf32, #tpu.memory_space<vmem>>, vector<1x96xf32>
    %7 = vector.broadcast %6 : vector<1x96xf32> to vector<4x96xf32>
    %8 = arith.addf %5, %7 : vector<4x96xf32>
    %c0_8 = arith.constant 0 : index
    %c0_9 = arith.constant 0 : index
    %9 = vector.load %arg7[%c0_8, %c0_9] : memref<1x96xf32, #tpu.memory_space<vmem>>, vector<1x96xf32>
    %c0_10 = arith.constant 0 : index
    %c0_11 = arith.constant 0 : index
    %10 = vector.load %arg9[%c0_10, %c0_11] : memref<4x32xf32, #tpu.memory_space<vmem>>, vector<4x32xf32>
    %c0_i32_12 = arith.constant 0 : i32
    %11 = arith.index_cast %c0_i32_12 : i32 to index
    %c0_13 = arith.constant 0 : index
    %c0_14 = arith.constant 0 : index
    %12 = vector.load %arg1[%11, %c0_13, %c0_14] : memref<8x4x32xf32, #tpu.memory_space<vmem>>, vector<1x4x32xf32>
    %13 = vector.shape_cast %12 : vector<1x4x32xf32> to vector<4x32xf32>
    %14 = arith.truncf %13 : vector<4x32xf32> to vector<4x32xbf16>
    %cst = arith.constant dense<0.000000e+00> : vector<4x96xf32>
    %15 = tpu.matmul %14, %3, %cst {dimension_numbers = #tpu.dot_dimension_numbers<[1], [0], [0], [1], [0, 0, 1, 1], [], []>} : vector<4x32xbf16>, vector<32x96xbf16>, vector<4x96xf32> -> vector<4x96xf32>
    %16 = arith.addf %15, %8 : vector<4x96xf32>
    %17 = arith.truncf %10 : vector<4x32xf32> to vector<4x32xbf16>
    %cst_15 = arith.constant dense<0.000000e+00> : vector<4x96xf32>
    %18 = tpu.matmul %17, %4, %cst_15 {dimension_numbers = #tpu.dot_dimension_numbers<[1], [0], [0], [1], [0, 0, 1, 1], [], []>} : vector<4x32xbf16>, vector<32x96xbf16>, vector<4x96xf32> -> vector<4x96xf32>
    %19 = vector.broadcast %9 : vector<1x96xf32> to vector<4x96xf32>
    %20 = arith.addf %18, %19 : vector<4x96xf32>
    %21 = vector.extract_strided_slice %16 {offsets = [0, 0], sizes = [4, 32], strides = [1, 1]} : vector<4x96xf32> to vector<4x32xf32>
    %22 = vector.extract_strided_slice %20 {offsets = [0, 0], sizes = [4, 32], strides = [1, 1]} : vector<4x96xf32> to vector<4x32xf32>
    %23 = arith.addf %21, %22 : vector<4x32xf32>
    %24 = arith.negf %23 : vector<4x32xf32>
    %25 = math.exp %24 : vector<4x32xf32>
    %cst_16 = arith.constant 1.000000e+00 : f32
    %26 = vector.broadcast %cst_16 : f32 to vector<4x32xf32>
    %27 = arith.addf %26, %25 : vector<4x32xf32>
    %28 = arith.divf %26, %27 : vector<4x32xf32>
    %29 = vector.extract_strided_slice %16 {offsets = [0, 32], sizes = [4, 32], strides = [1, 1]} : vector<4x96xf32> to vector<4x32xf32>
    %30 = vector.extract_strided_slice %20 {offsets = [0, 32], sizes = [4, 32], strides = [1, 1]} : vector<4x96xf32> to vector<4x32xf32>
    %31 = arith.addf %29, %30 : vector<4x32xf32>
    %32 = arith.negf %31 : vector<4x32xf32>
    %33 = math.exp %32 : vector<4x32xf32>
    %cst_17 = arith.constant 1.000000e+00 : f32
    %34 = vector.broadcast %cst_17 : f32 to vector<4x32xf32>
    %35 = arith.addf %34, %33 : vector<4x32xf32>
    %36 = arith.divf %34, %35 : vector<4x32xf32>
    %37 = vector.extract_strided_slice %16 {offsets = [0, 64], sizes = [4, 32], strides = [1, 1]} : vector<4x96xf32> to vector<4x32xf32>
    %38 = vector.extract_strided_slice %20 {offsets = [0, 64], sizes = [4, 32], strides = [1, 1]} : vector<4x96xf32> to vector<4x32xf32>
    %39 = arith.mulf %28, %38 : vector<4x32xf32>
    %40 = arith.addf %37, %39 : vector<4x32xf32>
    %41 = math.tanh %40 : vector<4x32xf32>
    %cst_18 = arith.constant 1.000000e+00 : f32
    %42 = vector.broadcast %cst_18 : f32 to vector<4x32xf32>
    %43 = arith.subf %42, %36 : vector<4x32xf32>
    %44 = arith.mulf %43, %41 : vector<4x32xf32>
    %45 = arith.mulf %36, %10 : vector<4x32xf32>
    %46 = arith.addf %44, %45 : vector<4x32xf32>
    %47 = arith.index_cast %c0_i32_12 : i32 to index
    %c0_19 = arith.constant 0 : index
    %c0_20 = arith.constant 0 : index
    %48 = vector.load %arg8[%47, %c0_19, %c0_20] : memref<8x4x32xf32, #tpu.memory_space<vmem>>, vector<1x4x32xf32>
    %49 = vector.shape_cast %48 : vector<1x4x32xf32> to vector<4x32xf32>
    %50 = vector.shape_cast %46 : vector<4x32xf32> to vector<1x4x32xf32>
    tpu.vector_store %arg8[%47, %c0_19, %c0_20], %50 {strides = array<i32>} : memref<8x4x32xf32, #tpu.memory_space<vmem>>, vector<1x4x32xf32>,
    %c1_i32 = arith.constant 1 : i32
    %51 = arith.index_cast %c1_i32 : i32 to index
    %c0_21 = arith.constant 0 : index
    %c0_22 = arith.constant 0 : index
    %52 = vector.load %arg1[%51, %c0_21, %c0_22] : memref<8x4x32xf32, #tpu.memory_space<vmem>>, vector<1x4x32xf32>
    %53 = vector.shape_cast %52 : vector<1x4x32xf32> to vector<4x32xf32>
    %54 = arith.truncf %53 : vector<4x32xf32> to vector<4x32xbf16>
    %cst_23 = arith.constant dense<0.000000e+00> : vector<4x96xf32>
    %55 = tpu.matmul %54, %3, %cst_23 {dimension_numbers = #tpu.dot_dimension_numbers<[1], [0], [0], [1], [0, 0, 1, 1], [], []>} : vector<4x32xbf16>, vector<32x96xbf16>, vector<4x96xf32> -> vector<4x96xf32>
    %56 = arith.addf %55, %8 : vector<4x96xf32>
    %57 = arith.truncf %46 : vector<4x32xf32> to vector<4x32xbf16>
    %cst_24 = arith.constant dense<0.000000e+00> : vector<4x96xf32>
    %58 = tpu.matmul %57, %4, %cst_24 {dimension_numbers = #tpu.dot_dimension_numbers<[1], [0], [0], [1], [0, 0, 1, 1], [], []>} : vector<4x32xbf16>, vector<32x96xbf16>, vector<4x96xf32> -> vector<4x96xf32>
    %59 = vector.broadcast %9 : vector<1x96xf32> to vector<4x96xf32>
    %60 = arith.addf %58, %59 : vector<4x96xf32>
    %61 = vector.extract_strided_slice %56 {offsets = [0, 0], sizes = [4, 32], strides = [1, 1]} : vector<4x96xf32> to vector<4x32xf32>
    %62 = vector.extract_strided_slice %60 {offsets = [0, 0], sizes = [4, 32], strides = [1, 1]} : vector<4x96xf32> to vector<4x32xf32>
    %63 = arith.addf %61, %62 : vector<4x32xf32>
    %64 = arith.negf %63 : vector<4x32xf32>
    %65 = math.exp %64 : vector<4x32xf32>
    %cst_25 = arith.constant 1.000000e+00 : f32
    %66 = vector.broadcast %cst_25 : f32 to vector<4x32xf32>
    %67 = arith.addf %66, %65 : vector<4x32xf32>
    %68 = arith.divf %66, %67 : vector<4x32xf32>
    %69 = vector.extract_strided_slice %56 {offsets = [0, 32], sizes = [4, 32], strides = [1, 1]} : vector<4x96xf32> to vector<4x32xf32>
    %70 = vector.extract_strided_slice %60 {offsets = [0, 32], sizes = [4, 32], strides = [1, 1]} : vector<4x96xf32> to vector<4x32xf32>
    %71 = arith.addf %69, %70 : vector<4x32xf32>
    %72 = arith.negf %71 : vector<4x32xf32>
    %73 = math.exp %72 : vector<4x32xf32>
    %cst_26 = arith.constant 1.000000e+00 : f32
    %74 = vector.broadcast %cst_26 : f32 to vector<4x32xf32>
    %75 = arith.addf %74, %73 : vector<4x32xf32>
    %76 = arith.divf %74, %75 : vector<4x32xf32>
    %77 = vector.extract_strided_slice %56 {offsets = [0, 64], sizes = [4, 32], strides = [1, 1]} : vector<4x96xf32> to vector<4x32xf32>
    %78 = vector.extract_strided_slice %60 {offsets = [0, 64], sizes = [4, 32], strides = [1, 1]} : vector<4x96xf32> to vector<4x32xf32>
    %79 = arith.mulf %68, %78 : vector<4x32xf32>
    %80 = arith.addf %77, %79 : vector<4x32xf32>
    %81 = math.tanh %80 : vector<4x32xf32>
    %cst_27 = arith.constant 1.000000e+00 : f32
    %82 = vector.broadcast %cst_27 : f32 to vector<4x32xf32>
    %83 = arith.subf %82, %76 : vector<4x32xf32>
    %84 = arith.mulf %83, %81 : vector<4x32xf32>
    %85 = arith.mulf %76, %46 : vector<4x32xf32>
    %86 = arith.addf %84, %85 : vector<4x32xf32>
    %87 = arith.index_cast %c1_i32 : i32 to index
    %c0_28 = arith.constant 0 : index
    %c0_29 = arith.constant 0 : index
    %88 = vector.load %arg8[%87, %c0_28, %c0_29] : memref<8x4x32xf32, #tpu.memory_space<vmem>>, vector<1x4x32xf32>
    %89 = vector.shape_cast %88 : vector<1x4x32xf32> to vector<4x32xf32>
    %90 = vector.shape_cast %86 : vector<4x32xf32> to vector<1x4x32xf32>
    tpu.vector_store %arg8[%87, %c0_28, %c0_29], %90 {strides = array<i32>} : memref<8x4x32xf32, #tpu.memory_space<vmem>>, vector<1x4x32xf32>,
    %c2_i32 = arith.constant 2 : i32
    %91 = arith.index_cast %c2_i32 : i32 to index
    %c0_30 = arith.constant 0 : index
    %c0_31 = arith.constant 0 : index
    %92 = vector.load %arg1[%91, %c0_30, %c0_31] : memref<8x4x32xf32, #tpu.memory_space<vmem>>, vector<1x4x32xf32>
    %93 = vector.shape_cast %92 : vector<1x4x32xf32> to vector<4x32xf32>
    %94 = arith.truncf %93 : vector<4x32xf32> to vector<4x32xbf16>
    %cst_32 = arith.constant dense<0.000000e+00> : vector<4x96xf32>
    %95 = tpu.matmul %94, %3, %cst_32 {dimension_numbers = #tpu.dot_dimension_numbers<[1], [0], [0], [1], [0, 0, 1, 1], [], []>} : vector<4x32xbf16>, vector<32x96xbf16>, vector<4x96xf32> -> vector<4x96xf32>
    %96 = arith.addf %95, %8 : vector<4x96xf32>
    %97 = arith.truncf %86 : vector<4x32xf32> to vector<4x32xbf16>
    %cst_33 = arith.constant dense<0.000000e+00> : vector<4x96xf32>
    %98 = tpu.matmul %97, %4, %cst_33 {dimension_numbers = #tpu.dot_dimension_numbers<[1], [0], [0], [1], [0, 0, 1, 1], [], []>} : vector<4x32xbf16>, vector<32x96xbf16>, vector<4x96xf32> -> vector<4x96xf32>
    %99 = vector.broadcast %9 : vector<1x96xf32> to vector<4x96xf32>
    %100 = arith.addf %98, %99 : vector<4x96xf32>
    %101 = vector.extract_strided_slice %96 {offsets = [0, 0], sizes = [4, 32], strides = [1, 1]} : vector<4x96xf32> to vector<4x32xf32>
    %102 = vector.extract_strided_slice %100 {offsets = [0, 0], sizes = [4, 32], strides = [1, 1]} : vector<4x96xf32> to vector<4x32xf32>
    %103 = arith.addf %101, %102 : vector<4x32xf32>
    %104 = arith.negf %103 : vector<4x32xf32>
    %105 = math.exp %104 : vector<4x32xf32>
    %cst_34 = arith.constant 1.000000e+00 : f32
    %106 = vector.broadcast %cst_34 : f32 to vector<4x32xf32>
    %107 = arith.addf %106, %105 : vector<4x32xf32>
    %108 = arith.divf %106, %107 : vector<4x32xf32>
    %109 = vector.extract_strided_slice %96 {offsets = [0, 32], sizes = [4, 32], strides = [1, 1]} : vector<4x96xf32> to vector<4x32xf32>
    %110 = vector.extract_strided_slice %100 {offsets = [0, 32], sizes = [4, 32], strides = [1, 1]} : vector<4x96xf32> to vector<4x32xf32>
    %111 = arith.addf %109, %110 : vector<4x32xf32>
    %112 = arith.negf %111 : vector<4x32xf32>
    %113 = math.exp %112 : vector<4x32xf32>
    %cst_35 = arith.constant 1.000000e+00 : f32
    %114 = vector.broadcast %cst_35 : f32 to vector<4x32xf32>
    %115 = arith.addf %114, %113 : vector<4x32xf32>
    %116 = arith.divf %114, %115 : vector<4x32xf32>
    %117 = vector.extract_strided_slice %96 {offsets = [0, 64], sizes = [4, 32], strides = [1, 1]} : vector<4x96xf32> to vector<4x32xf32>
    %118 = vector.extract_strided_slice %100 {offsets = [0, 64], sizes = [4, 32], strides = [1, 1]} : vector<4x96xf32> to vector<4x32xf32>
    %119 = arith.mulf %108, %118 : vector<4x32xf32>
    %120 = arith.addf %117, %119 : vector<4x32xf32>
    %121 = math.tanh %120 : vector<4x32xf32>
    %cst_36 = arith.constant 1.000000e+00 : f32
    %122 = vector.broadcast %cst_36 : f32 to vector<4x32xf32>
    %123 = arith.subf %122, %116 : vector<4x32xf32>
    %124 = arith.mulf %123, %121 : vector<4x32xf32>
    %125 = arith.mulf %116, %86 : vector<4x32xf32>
    %126 = arith.addf %124, %125 : vector<4x32xf32>
    %127 = arith.index_cast %c2_i32 : i32 to index
    %c0_37 = arith.constant 0 : index
    %c0_38 = arith.constant 0 : index
    %128 = vector.load %arg8[%127, %c0_37, %c0_38] : memref<8x4x32xf32, #tpu.memory_space<vmem>>, vector<1x4x32xf32>
    %129 = vector.shape_cast %128 : vector<1x4x32xf32> to vector<4x32xf32>
    %130 = vector.shape_cast %126 : vector<4x32xf32> to vector<1x4x32xf32>
    tpu.vector_store %arg8[%127, %c0_37, %c0_38], %130 {strides = array<i32>} : memref<8x4x32xf32, #tpu.memory_space<vmem>>, vector<1x4x32xf32>,
    %c3_i32 = arith.constant 3 : i32
    %131 = arith.index_cast %c3_i32 : i32 to index
    %c0_39 = arith.constant 0 : index
    %c0_40 = arith.constant 0 : index
    %132 = vector.load %arg1[%131, %c0_39, %c0_40] : memref<8x4x32xf32, #tpu.memory_space<vmem>>, vector<1x4x32xf32>
    %133 = vector.shape_cast %132 : vector<1x4x32xf32> to vector<4x32xf32>
    %134 = arith.truncf %133 : vector<4x32xf32> to vector<4x32xbf16>
    %cst_41 = arith.constant dense<0.000000e+00> : vector<4x96xf32>
    %135 = tpu.matmul %134, %3, %cst_41 {dimension_numbers = #tpu.dot_dimension_numbers<[1], [0], [0], [1], [0, 0, 1, 1], [], []>} : vector<4x32xbf16>, vector<32x96xbf16>, vector<4x96xf32> -> vector<4x96xf32>
    %136 = arith.addf %135, %8 : vector<4x96xf32>
    %137 = arith.truncf %126 : vector<4x32xf32> to vector<4x32xbf16>
    %cst_42 = arith.constant dense<0.000000e+00> : vector<4x96xf32>
    %138 = tpu.matmul %137, %4, %cst_42 {dimension_numbers = #tpu.dot_dimension_numbers<[1], [0], [0], [1], [0, 0, 1, 1], [], []>} : vector<4x32xbf16>, vector<32x96xbf16>, vector<4x96xf32> -> vector<4x96xf32>
    %139 = vector.broadcast %9 : vector<1x96xf32> to vector<4x96xf32>
    %140 = arith.addf %138, %139 : vector<4x96xf32>
    %141 = vector.extract_strided_slice %136 {offsets = [0, 0], sizes = [4, 32], strides = [1, 1]} : vector<4x96xf32> to vector<4x32xf32>
    %142 = vector.extract_strided_slice %140 {offsets = [0, 0], sizes = [4, 32], strides = [1, 1]} : vector<4x96xf32> to vector<4x32xf32>
    %143 = arith.addf %141, %142 : vector<4x32xf32>
    %144 = arith.negf %143 : vector<4x32xf32>
    %145 = math.exp %144 : vector<4x32xf32>
    %cst_43 = arith.constant 1.000000e+00 : f32
    %146 = vector.broadcast %cst_43 : f32 to vector<4x32xf32>
    %147 = arith.addf %146, %145 : vector<4x32xf32>
    %148 = arith.divf %146, %147 : vector<4x32xf32>
    %149 = vector.extract_strided_slice %136 {offsets = [0, 32], sizes = [4, 32], strides = [1, 1]} : vector<4x96xf32> to vector<4x32xf32>
    %150 = vector.extract_strided_slice %140 {offsets = [0, 32], sizes = [4, 32], strides = [1, 1]} : vector<4x96xf32> to vector<4x32xf32>
    %151 = arith.addf %149, %150 : vector<4x32xf32>
    %152 = arith.negf %151 : vector<4x32xf32>
    %153 = math.exp %152 : vector<4x32xf32>
    %cst_44 = arith.constant 1.000000e+00 : f32
    %154 = vector.broadcast %cst_44 : f32 to vector<4x32xf32>
    %155 = arith.addf %154, %153 : vector<4x32xf32>
    %156 = arith.divf %154, %155 : vector<4x32xf32>
    %157 = vector.extract_strided_slice %136 {offsets = [0, 64], sizes = [4, 32], strides = [1, 1]} : vector<4x96xf32> to vector<4x32xf32>
    %158 = vector.extract_strided_slice %140 {offsets = [0, 64], sizes = [4, 32], strides = [1, 1]} : vector<4x96xf32> to vector<4x32xf32>
    %159 = arith.mulf %148, %158 : vector<4x32xf32>
    %160 = arith.addf %157, %159 : vector<4x32xf32>
    %161 = math.tanh %160 : vector<4x32xf32>
    %cst_45 = arith.constant 1.000000e+00 : f32
    %162 = vector.broadcast %cst_45 : f32 to vector<4x32xf32>
    %163 = arith.subf %162, %156 : vector<4x32xf32>
    %164 = arith.mulf %163, %161 : vector<4x32xf32>
    %165 = arith.mulf %156, %126 : vector<4x32xf32>
    %166 = arith.addf %164, %165 : vector<4x32xf32>
    %167 = arith.index_cast %c3_i32 : i32 to index
    %c0_46 = arith.constant 0 : index
    %c0_47 = arith.constant 0 : index
    %168 = vector.load %arg8[%167, %c0_46, %c0_47] : memref<8x4x32xf32, #tpu.memory_space<vmem>>, vector<1x4x32xf32>
    %169 = vector.shape_cast %168 : vector<1x4x32xf32> to vector<4x32xf32>
    %170 = vector.shape_cast %166 : vector<4x32xf32> to vector<1x4x32xf32>
    tpu.vector_store %arg8[%167, %c0_46, %c0_47], %170 {strides = array<i32>} : memref<8x4x32xf32, #tpu.memory_space<vmem>>, vector<1x4x32xf32>,
    %c4_i32 = arith.constant 4 : i32
    %171 = arith.index_cast %c4_i32 : i32 to index
    %c0_48 = arith.constant 0 : index
    %c0_49 = arith.constant 0 : index
    %172 = vector.load %arg1[%171, %c0_48, %c0_49] : memref<8x4x32xf32, #tpu.memory_space<vmem>>, vector<1x4x32xf32>
    %173 = vector.shape_cast %172 : vector<1x4x32xf32> to vector<4x32xf32>
    %174 = arith.truncf %173 : vector<4x32xf32> to vector<4x32xbf16>
    %cst_50 = arith.constant dense<0.000000e+00> : vector<4x96xf32>
    %175 = tpu.matmul %174, %3, %cst_50 {dimension_numbers = #tpu.dot_dimension_numbers<[1], [0], [0], [1], [0, 0, 1, 1], [], []>} : vector<4x32xbf16>, vector<32x96xbf16>, vector<4x96xf32> -> vector<4x96xf32>
    %176 = arith.addf %175, %8 : vector<4x96xf32>
    %177 = arith.truncf %166 : vector<4x32xf32> to vector<4x32xbf16>
    %cst_51 = arith.constant dense<0.000000e+00> : vector<4x96xf32>
    %178 = tpu.matmul %177, %4, %cst_51 {dimension_numbers = #tpu.dot_dimension_numbers<[1], [0], [0], [1], [0, 0, 1, 1], [], []>} : vector<4x32xbf16>, vector<32x96xbf16>, vector<4x96xf32> -> vector<4x96xf32>
    %179 = vector.broadcast %9 : vector<1x96xf32> to vector<4x96xf32>
    %180 = arith.addf %178, %179 : vector<4x96xf32>
    %181 = vector.extract_strided_slice %176 {offsets = [0, 0], sizes = [4, 32], strides = [1, 1]} : vector<4x96xf32> to vector<4x32xf32>
    %182 = vector.extract_strided_slice %180 {offsets = [0, 0], sizes = [4, 32], strides = [1, 1]} : vector<4x96xf32> to vector<4x32xf32>
    %183 = arith.addf %181, %182 : vector<4x32xf32>
    %184 = arith.negf %183 : vector<4x32xf32>
    %185 = math.exp %184 : vector<4x32xf32>
    %cst_52 = arith.constant 1.000000e+00 : f32
    %186 = vector.broadcast %cst_52 : f32 to vector<4x32xf32>
    %187 = arith.addf %186, %185 : vector<4x32xf32>
    %188 = arith.divf %186, %187 : vector<4x32xf32>
    %189 = vector.extract_strided_slice %176 {offsets = [0, 32], sizes = [4, 32], strides = [1, 1]} : vector<4x96xf32> to vector<4x32xf32>
    %190 = vector.extract_strided_slice %180 {offsets = [0, 32], sizes = [4, 32], strides = [1, 1]} : vector<4x96xf32> to vector<4x32xf32>
    %191 = arith.addf %189, %190 : vector<4x32xf32>
    %192 = arith.negf %191 : vector<4x32xf32>
    %193 = math.exp %192 : vector<4x32xf32>
    %cst_53 = arith.constant 1.000000e+00 : f32
    %194 = vector.broadcast %cst_53 : f32 to vector<4x32xf32>
    %195 = arith.addf %194, %193 : vector<4x32xf32>
    %196 = arith.divf %194, %195 : vector<4x32xf32>
    %197 = vector.extract_strided_slice %176 {offsets = [0, 64], sizes = [4, 32], strides = [1, 1]} : vector<4x96xf32> to vector<4x32xf32>
    %198 = vector.extract_strided_slice %180 {offsets = [0, 64], sizes = [4, 32], strides = [1, 1]} : vector<4x96xf32> to vector<4x32xf32>
    %199 = arith.mulf %188, %198 : vector<4x32xf32>
    %200 = arith.addf %197, %199 : vector<4x32xf32>
    %201 = math.tanh %200 : vector<4x32xf32>
    %cst_54 = arith.constant 1.000000e+00 : f32
    %202 = vector.broadcast %cst_54 : f32 to vector<4x32xf32>
    %203 = arith.subf %202, %196 : vector<4x32xf32>
    %204 = arith.mulf %203, %201 : vector<4x32xf32>
    %205 = arith.mulf %196, %166 : vector<4x32xf32>
    %206 = arith.addf %204, %205 : vector<4x32xf32>
    %207 = arith.index_cast %c4_i32 : i32 to index
    %c0_55 = arith.constant 0 : index
    %c0_56 = arith.constant 0 : index
    %208 = vector.load %arg8[%207, %c0_55, %c0_56] : memref<8x4x32xf32, #tpu.memory_space<vmem>>, vector<1x4x32xf32>
    %209 = vector.shape_cast %208 : vector<1x4x32xf32> to vector<4x32xf32>
    %210 = vector.shape_cast %206 : vector<4x32xf32> to vector<1x4x32xf32>
    tpu.vector_store %arg8[%207, %c0_55, %c0_56], %210 {strides = array<i32>} : memref<8x4x32xf32, #tpu.memory_space<vmem>>, vector<1x4x32xf32>,
    %c5_i32 = arith.constant 5 : i32
    %211 = arith.index_cast %c5_i32 : i32 to index
    %c0_57 = arith.constant 0 : index
    %c0_58 = arith.constant 0 : index
    %212 = vector.load %arg1[%211, %c0_57, %c0_58] : memref<8x4x32xf32, #tpu.memory_space<vmem>>, vector<1x4x32xf32>
    %213 = vector.shape_cast %212 : vector<1x4x32xf32> to vector<4x32xf32>
    %214 = arith.truncf %213 : vector<4x32xf32> to vector<4x32xbf16>
    %cst_59 = arith.constant dense<0.000000e+00> : vector<4x96xf32>
    %215 = tpu.matmul %214, %3, %cst_59 {dimension_numbers = #tpu.dot_dimension_numbers<[1], [0], [0], [1], [0, 0, 1, 1], [], []>} : vector<4x32xbf16>, vector<32x96xbf16>, vector<4x96xf32> -> vector<4x96xf32>
    %216 = arith.addf %215, %8 : vector<4x96xf32>
    %217 = arith.truncf %206 : vector<4x32xf32> to vector<4x32xbf16>
    %cst_60 = arith.constant dense<0.000000e+00> : vector<4x96xf32>
    %218 = tpu.matmul %217, %4, %cst_60 {dimension_numbers = #tpu.dot_dimension_numbers<[1], [0], [0], [1], [0, 0, 1, 1], [], []>} : vector<4x32xbf16>, vector<32x96xbf16>, vector<4x96xf32> -> vector<4x96xf32>
    %219 = vector.broadcast %9 : vector<1x96xf32> to vector<4x96xf32>
    %220 = arith.addf %218, %219 : vector<4x96xf32>
    %221 = vector.extract_strided_slice %216 {offsets = [0, 0], sizes = [4, 32], strides = [1, 1]} : vector<4x96xf32> to vector<4x32xf32>
    %222 = vector.extract_strided_slice %220 {offsets = [0, 0], sizes = [4, 32], strides = [1, 1]} : vector<4x96xf32> to vector<4x32xf32>
    %223 = arith.addf %221, %222 : vector<4x32xf32>
    %224 = arith.negf %223 : vector<4x32xf32>
    %225 = math.exp %224 : vector<4x32xf32>
    %cst_61 = arith.constant 1.000000e+00 : f32
    %226 = vector.broadcast %cst_61 : f32 to vector<4x32xf32>
    %227 = arith.addf %226, %225 : vector<4x32xf32>
    %228 = arith.divf %226, %227 : vector<4x32xf32>
    %229 = vector.extract_strided_slice %216 {offsets = [0, 32], sizes = [4, 32], strides = [1, 1]} : vector<4x96xf32> to vector<4x32xf32>
    %230 = vector.extract_strided_slice %220 {offsets = [0, 32], sizes = [4, 32], strides = [1, 1]} : vector<4x96xf32> to vector<4x32xf32>
    %231 = arith.addf %229, %230 : vector<4x32xf32>
    %232 = arith.negf %231 : vector<4x32xf32>
    %233 = math.exp %232 : vector<4x32xf32>
    %cst_62 = arith.constant 1.000000e+00 : f32
    %234 = vector.broadcast %cst_62 : f32 to vector<4x32xf32>
    %235 = arith.addf %234, %233 : vector<4x32xf32>
    %236 = arith.divf %234, %235 : vector<4x32xf32>
    %237 = vector.extract_strided_slice %216 {offsets = [0, 64], sizes = [4, 32], strides = [1, 1]} : vector<4x96xf32> to vector<4x32xf32>
    %238 = vector.extract_strided_slice %220 {offsets = [0, 64], sizes = [4, 32], strides = [1, 1]} : vector<4x96xf32> to vector<4x32xf32>
    %239 = arith.mulf %228, %238 : vector<4x32xf32>
    %240 = arith.addf %237, %239 : vector<4x32xf32>
    %241 = math.tanh %240 : vector<4x32xf32>
    %cst_63 = arith.constant 1.000000e+00 : f32
    %242 = vector.broadcast %cst_63 : f32 to vector<4x32xf32>
    %243 = arith.subf %242, %236 : vector<4x32xf32>
    %244 = arith.mulf %243, %241 : vector<4x32xf32>
    %245 = arith.mulf %236, %206 : vector<4x32xf32>
    %246 = arith.addf %244, %245 : vector<4x32xf32>
    %247 = arith.index_cast %c5_i32 : i32 to index
    %c0_64 = arith.constant 0 : index
    %c0_65 = arith.constant 0 : index
    %248 = vector.load %arg8[%247, %c0_64, %c0_65] : memref<8x4x32xf32, #tpu.memory_space<vmem>>, vector<1x4x32xf32>
    %249 = vector.shape_cast %248 : vector<1x4x32xf32> to vector<4x32xf32>
    %250 = vector.shape_cast %246 : vector<4x32xf32> to vector<1x4x32xf32>
    tpu.vector_store %arg8[%247, %c0_64, %c0_65], %250 {strides = array<i32>} : memref<8x4x32xf32, #tpu.memory_space<vmem>>, vector<1x4x32xf32>,
    %c6_i32 = arith.constant 6 : i32
    %251 = arith.index_cast %c6_i32 : i32 to index
    %c0_66 = arith.constant 0 : index
    %c0_67 = arith.constant 0 : index
    %252 = vector.load %arg1[%251, %c0_66, %c0_67] : memref<8x4x32xf32, #tpu.memory_space<vmem>>, vector<1x4x32xf32>
    %253 = vector.shape_cast %252 : vector<1x4x32xf32> to vector<4x32xf32>
    %254 = arith.truncf %253 : vector<4x32xf32> to vector<4x32xbf16>
    %cst_68 = arith.constant dense<0.000000e+00> : vector<4x96xf32>
    %255 = tpu.matmul %254, %3, %cst_68 {dimension_numbers = #tpu.dot_dimension_numbers<[1], [0], [0], [1], [0, 0, 1, 1], [], []>} : vector<4x32xbf16>, vector<32x96xbf16>, vector<4x96xf32> -> vector<4x96xf32>
    %256 = arith.addf %255, %8 : vector<4x96xf32>
    %257 = arith.truncf %246 : vector<4x32xf32> to vector<4x32xbf16>
    %cst_69 = arith.constant dense<0.000000e+00> : vector<4x96xf32>
    %258 = tpu.matmul %257, %4, %cst_69 {dimension_numbers = #tpu.dot_dimension_numbers<[1], [0], [0], [1], [0, 0, 1, 1], [], []>} : vector<4x32xbf16>, vector<32x96xbf16>, vector<4x96xf32> -> vector<4x96xf32>
    %259 = vector.broadcast %9 : vector<1x96xf32> to vector<4x96xf32>
    %260 = arith.addf %258, %259 : vector<4x96xf32>
    %261 = vector.extract_strided_slice %256 {offsets = [0, 0], sizes = [4, 32], strides = [1, 1]} : vector<4x96xf32> to vector<4x32xf32>
    %262 = vector.extract_strided_slice %260 {offsets = [0, 0], sizes = [4, 32], strides = [1, 1]} : vector<4x96xf32> to vector<4x32xf32>
    %263 = arith.addf %261, %262 : vector<4x32xf32>
    %264 = arith.negf %263 : vector<4x32xf32>
    %265 = math.exp %264 : vector<4x32xf32>
    %cst_70 = arith.constant 1.000000e+00 : f32
    %266 = vector.broadcast %cst_70 : f32 to vector<4x32xf32>
    %267 = arith.addf %266, %265 : vector<4x32xf32>
    %268 = arith.divf %266, %267 : vector<4x32xf32>
    %269 = vector.extract_strided_slice %256 {offsets = [0, 32], sizes = [4, 32], strides = [1, 1]} : vector<4x96xf32> to vector<4x32xf32>
    %270 = vector.extract_strided_slice %260 {offsets = [0, 32], sizes = [4, 32], strides = [1, 1]} : vector<4x96xf32> to vector<4x32xf32>
    %271 = arith.addf %269, %270 : vector<4x32xf32>
    %272 = arith.negf %271 : vector<4x32xf32>
    %273 = math.exp %272 : vector<4x32xf32>
    %cst_71 = arith.constant 1.000000e+00 : f32
    %274 = vector.broadcast %cst_71 : f32 to vector<4x32xf32>
    %275 = arith.addf %274, %273 : vector<4x32xf32>
    %276 = arith.divf %274, %275 : vector<4x32xf32>
    %277 = vector.extract_strided_slice %256 {offsets = [0, 64], sizes = [4, 32], strides = [1, 1]} : vector<4x96xf32> to vector<4x32xf32>
    %278 = vector.extract_strided_slice %260 {offsets = [0, 64], sizes = [4, 32], strides = [1, 1]} : vector<4x96xf32> to vector<4x32xf32>
    %279 = arith.mulf %268, %278 : vector<4x32xf32>
    %280 = arith.addf %277, %279 : vector<4x32xf32>
    %281 = math.tanh %280 : vector<4x32xf32>
    %cst_72 = arith.constant 1.000000e+00 : f32
    %282 = vector.broadcast %cst_72 : f32 to vector<4x32xf32>
    %283 = arith.subf %282, %276 : vector<4x32xf32>
    %284 = arith.mulf %283, %281 : vector<4x32xf32>
    %285 = arith.mulf %276, %246 : vector<4x32xf32>
    %286 = arith.addf %284, %285 : vector<4x32xf32>
    %287 = arith.index_cast %c6_i32 : i32 to index
    %c0_73 = arith.constant 0 : index
    %c0_74 = arith.constant 0 : index
    %288 = vector.load %arg8[%287, %c0_73, %c0_74] : memref<8x4x32xf32, #tpu.memory_space<vmem>>, vector<1x4x32xf32>
    %289 = vector.shape_cast %288 : vector<1x4x32xf32> to vector<4x32xf32>
    %290 = vector.shape_cast %286 : vector<4x32xf32> to vector<1x4x32xf32>
    tpu.vector_store %arg8[%287, %c0_73, %c0_74], %290 {strides = array<i32>} : memref<8x4x32xf32, #tpu.memory_space<vmem>>, vector<1x4x32xf32>,
    %c7_i32 = arith.constant 7 : i32
    %291 = arith.index_cast %c7_i32 : i32 to index
    %c0_75 = arith.constant 0 : index
    %c0_76 = arith.constant 0 : index
    %292 = vector.load %arg1[%291, %c0_75, %c0_76] : memref<8x4x32xf32, #tpu.memory_space<vmem>>, vector<1x4x32xf32>
    %293 = vector.shape_cast %292 : vector<1x4x32xf32> to vector<4x32xf32>
    %294 = arith.truncf %293 : vector<4x32xf32> to vector<4x32xbf16>
    %cst_77 = arith.constant dense<0.000000e+00> : vector<4x96xf32>
    %295 = tpu.matmul %294, %3, %cst_77 {dimension_numbers = #tpu.dot_dimension_numbers<[1], [0], [0], [1], [0, 0, 1, 1], [], []>} : vector<4x32xbf16>, vector<32x96xbf16>, vector<4x96xf32> -> vector<4x96xf32>
    %296 = arith.addf %295, %8 : vector<4x96xf32>
    %297 = arith.truncf %286 : vector<4x32xf32> to vector<4x32xbf16>
    %cst_78 = arith.constant dense<0.000000e+00> : vector<4x96xf32>
    %298 = tpu.matmul %297, %4, %cst_78 {dimension_numbers = #tpu.dot_dimension_numbers<[1], [0], [0], [1], [0, 0, 1, 1], [], []>} : vector<4x32xbf16>, vector<32x96xbf16>, vector<4x96xf32> -> vector<4x96xf32>
    %299 = vector.broadcast %9 : vector<1x96xf32> to vector<4x96xf32>
    %300 = arith.addf %298, %299 : vector<4x96xf32>
    %301 = vector.extract_strided_slice %296 {offsets = [0, 0], sizes = [4, 32], strides = [1, 1]} : vector<4x96xf32> to vector<4x32xf32>
    %302 = vector.extract_strided_slice %300 {offsets = [0, 0], sizes = [4, 32], strides = [1, 1]} : vector<4x96xf32> to vector<4x32xf32>
    %303 = arith.addf %301, %302 : vector<4x32xf32>
    %304 = arith.negf %303 : vector<4x32xf32>
    %305 = math.exp %304 : vector<4x32xf32>
    %cst_79 = arith.constant 1.000000e+00 : f32
    %306 = vector.broadcast %cst_79 : f32 to vector<4x32xf32>
    %307 = arith.addf %306, %305 : vector<4x32xf32>
    %308 = arith.divf %306, %307 : vector<4x32xf32>
    %309 = vector.extract_strided_slice %296 {offsets = [0, 32], sizes = [4, 32], strides = [1, 1]} : vector<4x96xf32> to vector<4x32xf32>
    %310 = vector.extract_strided_slice %300 {offsets = [0, 32], sizes = [4, 32], strides = [1, 1]} : vector<4x96xf32> to vector<4x32xf32>
    %311 = arith.addf %309, %310 : vector<4x32xf32>
    %312 = arith.negf %311 : vector<4x32xf32>
    %313 = math.exp %312 : vector<4x32xf32>
    %cst_80 = arith.constant 1.000000e+00 : f32
    %314 = vector.broadcast %cst_80 : f32 to vector<4x32xf32>
    %315 = arith.addf %314, %313 : vector<4x32xf32>
    %316 = arith.divf %314, %315 : vector<4x32xf32>
    %317 = vector.extract_strided_slice %296 {offsets = [0, 64], sizes = [4, 32], strides = [1, 1]} : vector<4x96xf32> to vector<4x32xf32>
    %318 = vector.extract_strided_slice %300 {offsets = [0, 64], sizes = [4, 32], strides = [1, 1]} : vector<4x96xf32> to vector<4x32xf32>
    %319 = arith.mulf %308, %318 : vector<4x32xf32>
    %320 = arith.addf %317, %319 : vector<4x32xf32>
    %321 = math.tanh %320 : vector<4x32xf32>
    %cst_81 = arith.constant 1.000000e+00 : f32
    %322 = vector.broadcast %cst_81 : f32 to vector<4x32xf32>
    %323 = arith.subf %322, %316 : vector<4x32xf32>
    %324 = arith.mulf %323, %321 : vector<4x32xf32>
    %325 = arith.mulf %316, %286 : vector<4x32xf32>
    %326 = arith.addf %324, %325 : vector<4x32xf32>
    %327 = arith.index_cast %c7_i32 : i32 to index
    %c0_82 = arith.constant 0 : index
    %c0_83 = arith.constant 0 : index
    %328 = vector.load %arg8[%327, %c0_82, %c0_83] : memref<8x4x32xf32, #tpu.memory_space<vmem>>, vector<1x4x32xf32>
    %329 = vector.shape_cast %328 : vector<1x4x32xf32> to vector<4x32xf32>
    %330 = vector.shape_cast %326 : vector<4x32xf32> to vector<1x4x32xf32>
    tpu.vector_store %arg8[%327, %c0_82, %c0_83], %330 {strides = array<i32>} : memref<8x4x32xf32, #tpu.memory_space<vmem>>, vector<1x4x32xf32>,
    %c8_i32 = arith.constant 8 : i32
    %c0_84 = arith.constant 0 : index
    %c0_85 = arith.constant 0 : index
    %331 = vector.load %arg9[%c0_84, %c0_85] : memref<4x32xf32, #tpu.memory_space<vmem>>, vector<4x32xf32>
    tpu.vector_store %arg9[%c0_84, %c0_85], %326 {strides = array<i32>} : memref<4x32xf32, #tpu.memory_space<vmem>>, vector<4x32xf32>,
    return
  }
  func.func @transform_0(%arg0: i32) -> (i32, i32, i32) {
    %c0_i32 = arith.constant 0 : i32
    %c0_i32_0 = arith.constant 0 : i32
    %c0_i32_1 = arith.constant 0 : i32
    return %arg0, %c0_i32, %c0_i32_0 : i32, i32, i32
  }
  func.func @transform_1(%arg0: i32) -> (i32, i32) {
    %c0_i32 = arith.constant 0 : i32
    %c0_i32_0 = arith.constant 0 : i32
    %c0_i32_1 = arith.constant 0 : i32
    return %c0_i32, %c0_i32_0 : i32, i32
  }
  func.func @transform_2(%arg0: i32) -> (i32, i32) {
    %c0_i32 = arith.constant 0 : i32
    %c0_i32_0 = arith.constant 0 : i32
    %c0_i32_1 = arith.constant 0 : i32
    return %c0_i32, %c0_i32_0 : i32, i32
  }
  func.func @transform_3(%arg0: i32) -> (i32, i32) {
    %c0_i32 = arith.constant 0 : i32
    %c0_i32_0 = arith.constant 0 : i32
    %c0_i32_1 = arith.constant 0 : i32
    return %c0_i32, %c0_i32_0 : i32, i32
  }
  func.func @transform_4(%arg0: i32) -> (i32, i32) {
    %c0_i32 = arith.constant 0 : i32
    %c0_i32_0 = arith.constant 0 : i32
    %c0_i32_1 = arith.constant 0 : i32
    return %c0_i32, %c0_i32_0 : i32, i32
  }
  func.func @transform_5(%arg0: i32) -> (i32, i32) {
    %c0_i32 = arith.constant 0 : i32
    %c0_i32_0 = arith.constant 0 : i32
    %c0_i32_1 = arith.constant 0 : i32
    return %c0_i32, %c0_i32_0 : i32, i32
  }
  func.func @transform_6(%arg0: i32) -> (i32, i32) {
    %c0_i32 = arith.constant 0 : i32
    %c0_i32_0 = arith.constant 0 : i32
    %c0_i32_1 = arith.constant 0 : i32
    return %c0_i32, %c0_i32_0 : i32, i32
  }
  func.func @transform_7(%arg0: i32) -> (i32, i32, i32) {
    %c0_i32 = arith.constant 0 : i32
    %c0_i32_0 = arith.constant 0 : i32
    %c0_i32_1 = arith.constant 0 : i32
    return %arg0, %c0_i32, %c0_i32_0 : i32, i32, i32
  }
}

module attributes {stable_mosaic.version = 11 : i64} {
  func.func @_matmul_bias_kernel(%arg0: i32, %arg1: i32, %arg2: memref<32x32xf32, #tpu.memory_space<vmem>>, %arg3: memref<32x128xbf16, #tpu.memory_space<vmem>>, %arg4: memref<1x128xf32, #tpu.memory_space<vmem>>, %arg5: memref<32x128xf32, #tpu.memory_space<vmem>>) attributes {dimension_semantics = [#tpu.dimension_semantics<parallel>, #tpu.dimension_semantics<parallel>], iteration_bounds = array<i64: 1, 1>, scalar_prefetch = 0 : i64, scratch_operands = 0 : i64, tpu.core_type = #tpu.core_type<tc>, window_params = [{transform_indices = @transform_0, window_bounds = array<i64: 32, 32>}, {transform_indices = @transform_1, window_bounds = array<i64: 32, 128>}, {transform_indices = @transform_2, window_bounds = array<i64: 1, 128>}, {transform_indices = @transform_3, window_bounds = array<i64: 32, 128>}]} {
    %c0 = arith.constant 0 : index
    %c0_0 = arith.constant 0 : index
    %0 = vector.load %arg2[%c0, %c0_0] : memref<32x32xf32, #tpu.memory_space<vmem>>, vector<32x32xf32>
    %1 = arith.truncf %0 : vector<32x32xf32> to vector<32x32xbf16>
    %c0_1 = arith.constant 0 : index
    %c0_2 = arith.constant 0 : index
    %2 = vector.load %arg3[%c0_1, %c0_2] : memref<32x128xbf16, #tpu.memory_space<vmem>>, vector<32x128xbf16>
    %cst = arith.constant dense<0.000000e+00> : vector<32x128xf32>
    %3 = tpu.matmul %1, %2, %cst {dimension_numbers = #tpu.dot_dimension_numbers<[1], [0], [0], [1], [0, 0, 1, 1], [], []>} : vector<32x32xbf16>, vector<32x128xbf16>, vector<32x128xf32> -> vector<32x128xf32>
    %c0_3 = arith.constant 0 : index
    %c0_4 = arith.constant 0 : index
    %4 = vector.load %arg4[%c0_3, %c0_4] : memref<1x128xf32, #tpu.memory_space<vmem>>, vector<1x128xf32>
    %5 = vector.broadcast %4 : vector<1x128xf32> to vector<32x128xf32>
    %6 = arith.addf %3, %5 : vector<32x128xf32>
    %c0_5 = arith.constant 0 : index
    %c0_6 = arith.constant 0 : index
    %7 = vector.load %arg5[%c0_5, %c0_6] : memref<32x128xf32, #tpu.memory_space<vmem>>, vector<32x128xf32>
    tpu.vector_store %arg5[%c0_5, %c0_6], %6 {strides = array<i32>} : memref<32x128xf32, #tpu.memory_space<vmem>>, vector<32x128xf32>,
    return
  }
  func.func @transform_0(%arg0: i32, %arg1: i32) -> (i32, i32) {
    %c0_i32 = arith.constant 0 : i32
    %c0_i32_0 = arith.constant 0 : i32
    return %arg0, %c0_i32 : i32, i32
  }
  func.func @transform_1(%arg0: i32, %arg1: i32) -> (i32, i32) {
    %c0_i32 = arith.constant 0 : i32
    %c0_i32_0 = arith.constant 0 : i32
    return %c0_i32, %arg1 : i32, i32
  }
  func.func @transform_2(%arg0: i32, %arg1: i32) -> (i32, i32) {
    %c0_i32 = arith.constant 0 : i32
    %c0_i32_0 = arith.constant 0 : i32
    return %c0_i32, %arg1 : i32, i32
  }
  func.func @transform_3(%arg0: i32, %arg1: i32) -> (i32, i32) {
    %c0_i32 = arith.constant 0 : i32
    return %arg0, %arg1 : i32, i32
  }
}

module attributes {stable_mosaic.version = 11 : i64} {
  func.func @kernel(%arg0: i32, %arg1: memref<8x4x16xf32, #tpu.memory_space<vmem>>, %arg2: memref<4x96xf32, #tpu.memory_space<vmem>>, %arg3: memref<4x32xf32, #tpu.memory_space<vmem>>, %arg4: memref<16x96xbf16, #tpu.memory_space<vmem>>, %arg5: memref<32x96xbf16, #tpu.memory_space<vmem>>, %arg6: memref<1x96xf32, #tpu.memory_space<vmem>>, %arg7: memref<1x96xf32, #tpu.memory_space<vmem>>, %arg8: memref<8x4x32xf32, #tpu.memory_space<vmem>>, %arg9: memref<4x32xf32, #tpu.memory_space<vmem>>) attributes {dimension_semantics = [#tpu.dimension_semantics<arbitrary>], iteration_bounds = array<i64: 1>, scalar_prefetch = 0 : i64, scratch_operands = 1 : i64, tpu.core_type = #tpu.core_type<tc>, window_params = [{transform_indices = @transform_0, window_bounds = array<i64: 8, 4, 16>}, {pipeline_mode = #tpu.pipeline_mode<synchronous>, transform_indices = @transform_1, window_bounds = array<i64: 4, 96>}, {pipeline_mode = #tpu.pipeline_mode<synchronous>, transform_indices = @transform_2, window_bounds = array<i64: 4, 32>}, {pipeline_mode = #tpu.pipeline_mode<synchronous>, transform_indices = @transform_3, window_bounds = array<i64: 16, 96>}, {pipeline_mode = #tpu.pipeline_mode<synchronous>, transform_indices = @transform_4, window_bounds = array<i64: 32, 96>}, {pipeline_mode = #tpu.pipeline_mode<synchronous>, transform_indices = @transform_5, window_bounds = array<i64: 1, 96>}, {pipeline_mode = #tpu.pipeline_mode<synchronous>, transform_indices = @transform_6, window_bounds = array<i64: 1, 96>}, {transform_indices = @transform_7, window_bounds = array<i64: 8, 4, 32>}]} {
    %c0_i32 = arith.constant 0 : i32
    %0 = arith.cmpi eq, %arg0, %c0_i32 : i32
    %1 = arith.extui %0 : i1 to i32
    %c0_i32_0 = arith.constant 0 : i32
    %2 = arith.cmpi ne, %1, %c0_i32_0 : i32
    scf.if %2 {
      %c0_86 = arith.constant 0 : index
      %c0_87 = arith.constant 0 : index
      %332 = vector.load %arg3[%c0_86, %c0_87] : memref<4x32xf32, #tpu.memory_space<vmem>>, vector<4x32xf32>
      %c0_88 = arith.constant 0 : index
      %c0_89 = arith.constant 0 : index
      %333 = vector.load %arg9[%c0_88, %c0_89] : memref<4x32xf32, #tpu.memory_space<vmem>>, vector<4x32xf32>
      tpu.vector_store %arg9[%c0_88, %c0_89], %332 {strides = array<i32>} : memref<4x32xf32, #tpu.memory_space<vmem>>, vector<4x32xf32>,
    } else {
    }
    %c0 = arith.constant 0 : index
    %c0_1 = arith.constant 0 : index
    %3 = vector.load %arg4[%c0, %c0_1] : memref<16x96xbf16, #tpu.memory_space<vmem>>, vector<16x96xbf16>
    %c0_2 = arith.constant 0 : index
    %c0_3 = arith.constant 0 : index
    %4 = vector.load %arg5[%c0_2, %c0_3] : memref<32x96xbf16, #tpu.memory_space<vmem>>, vector<32x96xbf16>
    %c0_4 = arith.constant 0 : index
    %c0_5 = arith.constant 0 : index
    %5 = vector.load %arg2[%c0_4, %c0_5] : memref<4x96xf32, #tpu.memory_space<vmem>>, vector<4x96xf32>
    %c0_6 = arith.constant 0 : index
    %c0_7 = arith.constant 0 : index
    %6 = vector.load %arg6[%c0_6, %c0_7] : memref<1x96xf32, #tpu.memory_space<vmem>>, vector<1x96xf32>
    %7 = vector.broadcast %6 : vector<1x96xf32> to vector<4x96xf32>
    %8 = arith.addf %5, %7 : vector<4x96xf32>
    %c0_8 = arith.constant 0 : index
    %c0_9 = arith.constant 0 : index
    %9 = vector.load %arg7[%c0_8, %c0_9] : memref<1x96xf32, #tpu.memory_space<vmem>>, vector<1x96xf32>
    %c0_10 = arith.constant 0 : index
    %c0_11 = arith.constant 0 : index
    %10 = vector.load %arg9[%c0_10, %c0_11] : memref<4x32xf32, #tpu.memory_space<vmem>>, vector<4x32xf32>
    %c0_i32_12 = arith.constant 0 : i32
    %11 = arith.index_cast %c0_i32_12 : i32 to index
    %c0_13 = arith.constant 0 : index
    %c0_14 = arith.constant 0 : index
    %12 = vector.load %arg1[%11, %c0_13, %c0_14] : memref<8x4x16xf32, #tpu.memory_space<vmem>>, vector<1x4x16xf32>
    %13 = vector.shape_cast %12 : vector<1x4x16xf32> to vector<4x16xf32>
    %14 = arith.truncf %13 : vector<4x16xf32> to vector<4x16xbf16>
    %cst = arith.constant dense<0.000000e+00> : vector<4x96xf32>
    %15 = tpu.matmul %14, %3, %cst {dimension_numbers = #tpu.dot_dimension_numbers<[1], [0], [0], [1], [0, 0, 1, 1], [], []>} : vector<4x16xbf16>, vector<16x96xbf16>, vector<4x96xf32> -> vector<4x96xf32>
    %16 = arith.addf %15, %8 : vector<4x96xf32>
    %17 = arith.truncf %10 : vector<4x32xf32> to vector<4x32xbf16>
    %cst_15 = arith.constant dense<0.000000e+00> : vector<4x96xf32>
    %18 = tpu.matmul %17, %4, %cst_15 {dimension_numbers = #tpu.dot_dimension_numbers<[1], [0], [0], [1], [0, 0, 1, 1], [], []>} : vector<4x32xbf16>, vector<32x96xbf16>, vector<4x96xf32> -> vector<4x96xf32>
    %19 = vector.broadcast %9 : vector<1x96xf32> to vector<4x96xf32>
    %20 = arith.addf %18, %19 : vector<4x96xf32>
    %21 = vector.extract_strided_slice %16 {offsets = [0, 0], sizes = [4, 32], strides = [1, 1]} : vector<4x96xf32> to vector<4x32xf32>
    %22 = vector.extract_strided_slice %20 {offsets = [0, 0], sizes = [4, 32], strides = [1, 1]} : vector<4x96xf32> to vector<4x32xf32>
    %23 = arith.addf %21, %22 : vector<4x32xf32>
    %24 = arith.negf %23 : vector<4x32xf32>
    %25 = math.exp %24 : vector<4x32xf32>
    %cst_16 = arith.constant 1.000000e+00 : f32
    %26 = vector.broadcast %cst_16 : f32 to vector<4x32xf32>
    %27 = arith.addf %26, %25 : vector<4x32xf32>
    %28 = arith.divf %26, %27 : vector<4x32xf32>
    %29 = vector.extract_strided_slice %16 {offsets = [0, 32], sizes = [4, 32], strides = [1, 1]} : vector<4x96xf32> to vector<4x32xf32>
    %30 = vector.extract_strided_slice %20 {offsets = [0, 32], sizes = [4, 32], strides = [1, 1]} : vector<4x96xf32> to vector<4x32xf32>
    %31 = arith.addf %29, %30 : vector<4x32xf32>
    %32 = arith.negf %31 : vector<4x32xf32>
    %33 = math.exp %32 : vector<4x32xf32>
    %cst_17 = arith.constant 1.000000e+00 : f32
    %34 = vector.broadcast %cst_17 : f32 to vector<4x32xf32>
    %35 = arith.addf %34, %33 : vector<4x32xf32>
    %36 = arith.divf %34, %35 : vector<4x32xf32>
    %37 = vector.extract_strided_slice %16 {offsets = [0, 64], sizes = [4, 32], strides = [1, 1]} : vector<4x96xf32> to vector<4x32xf32>
    %38 = vector.extract_strided_slice %20 {offsets = [0, 64], sizes = [4, 32], strides = [1, 1]} : vector<4x96xf32> to vector<4x32xf32>
    %39 = arith.mulf %28, %38 : vector<4x32xf32>
    %40 = arith.addf %37, %39 : vector<4x32xf32>
    %41 = math.tanh %40 : vector<4x32xf32>
    %cst_18 = arith.constant 1.000000e+00 : f32
    %42 = vector.broadcast %cst_18 : f32 to vector<4x32xf32>
    %43 = arith.subf %42, %36 : vector<4x32xf32>
    %44 = arith.mulf %43, %41 : vector<4x32xf32>
    %45 = arith.mulf %36, %10 : vector<4x32xf32>
    %46 = arith.addf %44, %45 : vector<4x32xf32>
    %47 = arith.index_cast %c0_i32_12 : i32 to index
    %c0_19 = arith.constant 0 : index
    %c0_20 = arith.constant 0 : index
    %48 = vector.load %arg8[%47, %c0_19, %c0_20] : memref<8x4x32xf32, #tpu.memory_space<vmem>>, vector<1x4x32xf32>
    %49 = vector.shape_cast %48 : vector<1x4x32xf32> to vector<4x32xf32>
    %50 = vector.shape_cast %46 : vector<4x32xf32> to vector<1x4x32xf32>
    tpu.vector_store %arg8[%47, %c0_19, %c0_20], %50 {strides = array<i32>} : memref<8x4x32xf32, #tpu.memory_space<vmem>>, vector<1x4x32xf32>,
    %c1_i32 = arith.constant 1 : i32
    %51 = arith.index_cast %c1_i32 : i32 to index
    %c0_21 = arith.constant 0 : index
    %c0_22 = arith.constant 0 : index
    %52 = vector.load %arg1[%51, %c0_21, %c0_22] : memref<8x4x16xf32, #tpu.memory_space<vmem>>, vector<1x4x16xf32>
    %53 = vector.shape_cast %52 : vector<1x4x16xf32> to vector<4x16xf32>
    %54 = arith.truncf %53 : vector<4x16xf32> to vector<4x16xbf16>
    %cst_23 = arith.constant dense<0.000000e+00> : vector<4x96xf32>
    %55 = tpu.matmul %54, %3, %cst_23 {dimension_numbers = #tpu.dot_dimension_numbers<[1], [0], [0], [1], [0, 0, 1, 1], [], []>} : vector<4x16xbf16>, vector<16x96xbf16>, vector<4x96xf32> -> vector<4x96xf32>
    %56 = arith.addf %55, %8 : vector<4x96xf32>
    %57 = arith.truncf %46 : vector<4x32xf32> to vector<4x32xbf16>
    %cst_24 = arith.constant dense<0.000000e+00> : vector<4x96xf32>
    %58 = tpu.matmul %57, %4, %cst_24 {dimension_numbers = #tpu.dot_dimension_numbers<[1], [0], [0], [1], [0, 0, 1, 1], [], []>} : vector<4x32xbf16>, vector<32x96xbf16>, vector<4x96xf32> -> vector<4x96xf32>
    %59 = vector.broadcast %9 : vector<1x96xf32> to vector<4x96xf32>
    %60 = arith.addf %58, %59 : vector<4x96xf32>
    %61 = vector.extract_strided_slice %56 {offsets = [0, 0], sizes = [4, 32], strides = [1, 1]} : vector<4x96xf32> to vector<4x32xf32>
    %62 = vector.extract_strided_slice %60 {offsets = [0, 0], sizes = [4, 32], strides = [1, 1]} : vector<4x96xf32> to vector<4x32xf32>
    %63 = arith.addf %61, %62 : vector<4x32xf32>
    %64 = arith.negf %63 : vector<4x32xf32>
    %65 = math.exp %64 : vector<4x32xf32>
    %cst_25 = arith.constant 1.000000e+00 : f32
    %66 = vector.broadcast %cst_25 : f32 to vector<4x32xf32>
    %67 = arith.addf %66, %65 : vector<4x32xf32>
    %68 = arith.divf %66, %67 : vector<4x32xf32>
    %69 = vector.extract_strided_slice %56 {offsets = [0, 32], sizes = [4, 32], strides = [1, 1]} : vector<4x96xf32> to vector<4x32xf32>
    %70 = vector.extract_strided_slice %60 {offsets = [0, 32], sizes = [4, 32], strides = [1, 1]} : vector<4x96xf32> to vector<4x32xf32>
    %71 = arith.addf %69, %70 : vector<4x32xf32>
    %72 = arith.negf %71 : vector<4x32xf32>
    %73 = math.exp %72 : vector<4x32xf32>
    %cst_26 = arith.constant 1.000000e+00 : f32
    %74 = vector.broadcast %cst_26 : f32 to vector<4x32xf32>
    %75 = arith.addf %74, %73 : vector<4x32xf32>
    %76 = arith.divf %74, %75 : vector<4x32xf32>
    %77 = vector.extract_strided_slice %56 {offsets = [0, 64], sizes = [4, 32], strides = [1, 1]} : vector<4x96xf32> to vector<4x32xf32>
    %78 = vector.extract_strided_slice %60 {offsets = [0, 64], sizes = [4, 32], strides = [1, 1]} : vector<4x96xf32> to vector<4x32xf32>
    %79 = arith.mulf %68, %78 : vector<4x32xf32>
    %80 = arith.addf %77, %79 : vector<4x32xf32>
    %81 = math.tanh %80 : vector<4x32xf32>
    %cst_27 = arith.constant 1.000000e+00 : f32
    %82 = vector.broadcast %cst_27 : f32 to vector<4x32xf32>
    %83 = arith.subf %82, %76 : vector<4x32xf32>
    %84 = arith.mulf %83, %81 : vector<4x32xf32>
    %85 = arith.mulf %76, %46 : vector<4x32xf32>
    %86 = arith.addf %84, %85 : vector<4x32xf32>
    %87 = arith.index_cast %c1_i32 : i32 to index
    %c0_28 = arith.constant 0 : index
    %c0_29 = arith.constant 0 : index
    %88 = vector.load %arg8[%87, %c0_28, %c0_29] : memref<8x4x32xf32, #tpu.memory_space<vmem>>, vector<1x4x32xf32>
    %89 = vector.shape_cast %88 : vector<1x4x32xf32> to vector<4x32xf32>
    %90 = vector.shape_cast %86 : vector<4x32xf32> to vector<1x4x32xf32>
    tpu.vector_store %arg8[%87, %c0_28, %c0_29], %90 {strides = array<i32>} : memref<8x4x32xf32, #tpu.memory_space<vmem>>, vector<1x4x32xf32>,
    %c2_i32 = arith.constant 2 : i32
    %91 = arith.index_cast %c2_i32 : i32 to index
    %c0_30 = arith.constant 0 : index
    %c0_31 = arith.constant 0 : index
    %92 = vector.load %arg1[%91, %c0_30, %c0_31] : memref<8x4x16xf32, #tpu.memory_space<vmem>>, vector<1x4x16xf32>
    %93 = vector.shape_cast %92 : vector<1x4x16xf32> to vector<4x16xf32>
    %94 = arith.truncf %93 : vector<4x16xf32> to vector<4x16xbf16>
    %cst_32 = arith.constant dense<0.000000e+00> : vector<4x96xf32>
    %95 = tpu.matmul %94, %3, %cst_32 {dimension_numbers = #tpu.dot_dimension_numbers<[1], [0], [0], [1], [0, 0, 1, 1], [], []>} : vector<4x16xbf16>, vector<16x96xbf16>, vector<4x96xf32> -> vector<4x96xf32>
    %96 = arith.addf %95, %8 : vector<4x96xf32>
    %97 = arith.truncf %86 : vector<4x32xf32> to vector<4x32xbf16>
    %cst_33 = arith.constant dense<0.000000e+00> : vector<4x96xf32>
    %98 = tpu.matmul %97, %4, %cst_33 {dimension_numbers = #tpu.dot_dimension_numbers<[1], [0], [0], [1], [0, 0, 1, 1], [], []>} : vector<4x32xbf16>, vector<32x96xbf16>, vector<4x96xf32> -> vector<4x96xf32>
    %99 = vector.broadcast %9 : vector<1x96xf32> to vector<4x96xf32>
    %100 = arith.addf %98, %99 : vector<4x96xf32>
    %101 = vector.extract_strided_slice %96 {offsets = [0, 0], sizes = [4, 32], strides = [1, 1]} : vector<4x96xf32> to vector<4x32xf32>
    %102 = vector.extract_strided_slice %100 {offsets = [0, 0], sizes = [4, 32], strides = [1, 1]} : vector<4x96xf32> to vector<4x32xf32>
    %103 = arith.addf %101, %102 : vector<4x32xf32>
    %104 = arith.negf %103 : vector<4x32xf32>
    %105 = math.exp %104 : vector<4x32xf32>
    %cst_34 = arith.constant 1.000000e+00 : f32
    %106 = vector.broadcast %cst_34 : f32 to vector<4x32xf32>
    %107 = arith.addf %106, %105 : vector<4x32xf32>
    %108 = arith.divf %106, %107 : vector<4x32xf32>
    %109 = vector.extract_strided_slice %96 {offsets = [0, 32], sizes = [4, 32], strides = [1, 1]} : vector<4x96xf32> to vector<4x32xf32>
    %110 = vector.extract_strided_slice %100 {offsets = [0, 32], sizes = [4, 32], strides = [1, 1]} : vector<4x96xf32> to vector<4x32xf32>
    %111 = arith.addf %109, %110 : vector<4x32xf32>
    %112 = arith.negf %111 : vector<4x32xf32>
    %113 = math.exp %112 : vector<4x32xf32>
    %cst_35 = arith.constant 1.000000e+00 : f32
    %114 = vector.broadcast %cst_35 : f32 to vector<4x32xf32>
    %115 = arith.addf %114, %113 : vector<4x32xf32>
    %116 = arith.divf %114, %115 : vector<4x32xf32>
    %117 = vector.extract_strided_slice %96 {offsets = [0, 64], sizes = [4, 32], strides = [1, 1]} : vector<4x96xf32> to vector<4x32xf32>
    %118 = vector.extract_strided_slice %100 {offsets = [0, 64], sizes = [4, 32], strides = [1, 1]} : vector<4x96xf32> to vector<4x32xf32>
    %119 = arith.mulf %108, %118 : vector<4x32xf32>
    %120 = arith.addf %117, %119 : vector<4x32xf32>
    %121 = math.tanh %120 : vector<4x32xf32>
    %cst_36 = arith.constant 1.000000e+00 : f32
    %122 = vector.broadcast %cst_36 : f32 to vector<4x32xf32>
    %123 = arith.subf %122, %116 : vector<4x32xf32>
    %124 = arith.mulf %123, %121 : vector<4x32xf32>
    %125 = arith.mulf %116, %86 : vector<4x32xf32>
    %126 = arith.addf %124, %125 : vector<4x32xf32>
    %127 = arith.index_cast %c2_i32 : i32 to index
    %c0_37 = arith.constant 0 : index
    %c0_38 = arith.constant 0 : index
    %128 = vector.load %arg8[%127, %c0_37, %c0_38] : memref<8x4x32xf32, #tpu.memory_space<vmem>>, vector<1x4x32xf32>
    %129 = vector.shape_cast %128 : vector<1x4x32xf32> to vector<4x32xf32>
    %130 = vector.shape_cast %126 : vector<4x32xf32> to vector<1x4x32xf32>
    tpu.vector_store %arg8[%127, %c0_37, %c0_38], %130 {strides = array<i32>} : memref<8x4x32xf32, #tpu.memory_space<vmem>>, vector<1x4x32xf32>,
    %c3_i32 = arith.constant 3 : i32
    %131 = arith.index_cast %c3_i32 : i32 to index
    %c0_39 = arith.constant 0 : index
    %c0_40 = arith.constant 0 : index
    %132 = vector.load %arg1[%131, %c0_39, %c0_40] : memref<8x4x16xf32, #tpu.memory_space<vmem>>, vector<1x4x16xf32>
    %133 = vector.shape_cast %132 : vector<1x4x16xf32> to vector<4x16xf32>
    %134 = arith.truncf %133 : vector<4x16xf32> to vector<4x16xbf16>
    %cst_41 = arith.constant dense<0.000000e+00> : vector<4x96xf32>
    %135 = tpu.matmul %134, %3, %cst_41 {dimension_numbers = #tpu.dot_dimension_numbers<[1], [0], [0], [1], [0, 0, 1, 1], [], []>} : vector<4x16xbf16>, vector<16x96xbf16>, vector<4x96xf32> -> vector<4x96xf32>
    %136 = arith.addf %135, %8 : vector<4x96xf32>
    %137 = arith.truncf %126 : vector<4x32xf32> to vector<4x32xbf16>
    %cst_42 = arith.constant dense<0.000000e+00> : vector<4x96xf32>
    %138 = tpu.matmul %137, %4, %cst_42 {dimension_numbers = #tpu.dot_dimension_numbers<[1], [0], [0], [1], [0, 0, 1, 1], [], []>} : vector<4x32xbf16>, vector<32x96xbf16>, vector<4x96xf32> -> vector<4x96xf32>
    %139 = vector.broadcast %9 : vector<1x96xf32> to vector<4x96xf32>
    %140 = arith.addf %138, %139 : vector<4x96xf32>
    %141 = vector.extract_strided_slice %136 {offsets = [0, 0], sizes = [4, 32], strides = [1, 1]} : vector<4x96xf32> to vector<4x32xf32>
    %142 = vector.extract_strided_slice %140 {offsets = [0, 0], sizes = [4, 32], strides = [1, 1]} : vector<4x96xf32> to vector<4x32xf32>
    %143 = arith.addf %141, %142 : vector<4x32xf32>
    %144 = arith.negf %143 : vector<4x32xf32>
    %145 = math.exp %144 : vector<4x32xf32>
    %cst_43 = arith.constant 1.000000e+00 : f32
    %146 = vector.broadcast %cst_43 : f32 to vector<4x32xf32>
    %147 = arith.addf %146, %145 : vector<4x32xf32>
    %148 = arith.divf %146, %147 : vector<4x32xf32>
    %149 = vector.extract_strided_slice %136 {offsets = [0, 32], sizes = [4, 32], strides = [1, 1]} : vector<4x96xf32> to vector<4x32xf32>
    %150 = vector.extract_strided_slice %140 {offsets = [0, 32], sizes = [4, 32], strides = [1, 1]} : vector<4x96xf32> to vector<4x32xf32>
    %151 = arith.addf %149, %150 : vector<4x32xf32>
    %152 = arith.negf %151 : vector<4x32xf32>
    %153 = math.exp %152 : vector<4x32xf32>
    %cst_44 = arith.constant 1.000000e+00 : f32
    %154 = vector.broadcast %cst_44 : f32 to vector<4x32xf32>
    %155 = arith.addf %154, %153 : vector<4x32xf32>
    %156 = arith.divf %154, %155 : vector<4x32xf32>
    %157 = vector.extract_strided_slice %136 {offsets = [0, 64], sizes = [4, 32], strides = [1, 1]} : vector<4x96xf32> to vector<4x32xf32>
    %158 = vector.extract_strided_slice %140 {offsets = [0, 64], sizes = [4, 32], strides = [1, 1]} : vector<4x96xf32> to vector<4x32xf32>
    %159 = arith.mulf %148, %158 : vector<4x32xf32>
    %160 = arith.addf %157, %159 : vector<4x32xf32>
    %161 = math.tanh %160 : vector<4x32xf32>
    %cst_45 = arith.constant 1.000000e+00 : f32
    %162 = vector.broadcast %cst_45 : f32 to vector<4x32xf32>
    %163 = arith.subf %162, %156 : vector<4x32xf32>
    %164 = arith.mulf %163, %161 : vector<4x32xf32>
    %165 = arith.mulf %156, %126 : vector<4x32xf32>
    %166 = arith.addf %164, %165 : vector<4x32xf32>
    %167 = arith.index_cast %c3_i32 : i32 to index
    %c0_46 = arith.constant 0 : index
    %c0_47 = arith.constant 0 : index
    %168 = vector.load %arg8[%167, %c0_46, %c0_47] : memref<8x4x32xf32, #tpu.memory_space<vmem>>, vector<1x4x32xf32>
    %169 = vector.shape_cast %168 : vector<1x4x32xf32> to vector<4x32xf32>
    %170 = vector.shape_cast %166 : vector<4x32xf32> to vector<1x4x32xf32>
    tpu.vector_store %arg8[%167, %c0_46, %c0_47], %170 {strides = array<i32>} : memref<8x4x32xf32, #tpu.memory_space<vmem>>, vector<1x4x32xf32>,
    %c4_i32 = arith.constant 4 : i32
    %171 = arith.index_cast %c4_i32 : i32 to index
    %c0_48 = arith.constant 0 : index
    %c0_49 = arith.constant 0 : index
    %172 = vector.load %arg1[%171, %c0_48, %c0_49] : memref<8x4x16xf32, #tpu.memory_space<vmem>>, vector<1x4x16xf32>
    %173 = vector.shape_cast %172 : vector<1x4x16xf32> to vector<4x16xf32>
    %174 = arith.truncf %173 : vector<4x16xf32> to vector<4x16xbf16>
    %cst_50 = arith.constant dense<0.000000e+00> : vector<4x96xf32>
    %175 = tpu.matmul %174, %3, %cst_50 {dimension_numbers = #tpu.dot_dimension_numbers<[1], [0], [0], [1], [0, 0, 1, 1], [], []>} : vector<4x16xbf16>, vector<16x96xbf16>, vector<4x96xf32> -> vector<4x96xf32>
    %176 = arith.addf %175, %8 : vector<4x96xf32>
    %177 = arith.truncf %166 : vector<4x32xf32> to vector<4x32xbf16>
    %cst_51 = arith.constant dense<0.000000e+00> : vector<4x96xf32>
    %178 = tpu.matmul %177, %4, %cst_51 {dimension_numbers = #tpu.dot_dimension_numbers<[1], [0], [0], [1], [0, 0, 1, 1], [], []>} : vector<4x32xbf16>, vector<32x96xbf16>, vector<4x96xf32> -> vector<4x96xf32>
    %179 = vector.broadcast %9 : vector<1x96xf32> to vector<4x96xf32>
    %180 = arith.addf %178, %179 : vector<4x96xf32>
    %181 = vector.extract_strided_slice %176 {offsets = [0, 0], sizes = [4, 32], strides = [1, 1]} : vector<4x96xf32> to vector<4x32xf32>
    %182 = vector.extract_strided_slice %180 {offsets = [0, 0], sizes = [4, 32], strides = [1, 1]} : vector<4x96xf32> to vector<4x32xf32>
    %183 = arith.addf %181, %182 : vector<4x32xf32>
    %184 = arith.negf %183 : vector<4x32xf32>
    %185 = math.exp %184 : vector<4x32xf32>
    %cst_52 = arith.constant 1.000000e+00 : f32
    %186 = vector.broadcast %cst_52 : f32 to vector<4x32xf32>
    %187 = arith.addf %186, %185 : vector<4x32xf32>
    %188 = arith.divf %186, %187 : vector<4x32xf32>
    %189 = vector.extract_strided_slice %176 {offsets = [0, 32], sizes = [4, 32], strides = [1, 1]} : vector<4x96xf32> to vector<4x32xf32>
    %190 = vector.extract_strided_slice %180 {offsets = [0, 32], sizes = [4, 32], strides = [1, 1]} : vector<4x96xf32> to vector<4x32xf32>
    %191 = arith.addf %189, %190 : vector<4x32xf32>
    %192 = arith.negf %191 : vector<4x32xf32>
    %193 = math.exp %192 : vector<4x32xf32>
    %cst_53 = arith.constant 1.000000e+00 : f32
    %194 = vector.broadcast %cst_53 : f32 to vector<4x32xf32>
    %195 = arith.addf %194, %193 : vector<4x32xf32>
    %196 = arith.divf %194, %195 : vector<4x32xf32>
    %197 = vector.extract_strided_slice %176 {offsets = [0, 64], sizes = [4, 32], strides = [1, 1]} : vector<4x96xf32> to vector<4x32xf32>
    %198 = vector.extract_strided_slice %180 {offsets = [0, 64], sizes = [4, 32], strides = [1, 1]} : vector<4x96xf32> to vector<4x32xf32>
    %199 = arith.mulf %188, %198 : vector<4x32xf32>
    %200 = arith.addf %197, %199 : vector<4x32xf32>
    %201 = math.tanh %200 : vector<4x32xf32>
    %cst_54 = arith.constant 1.000000e+00 : f32
    %202 = vector.broadcast %cst_54 : f32 to vector<4x32xf32>
    %203 = arith.subf %202, %196 : vector<4x32xf32>
    %204 = arith.mulf %203, %201 : vector<4x32xf32>
    %205 = arith.mulf %196, %166 : vector<4x32xf32>
    %206 = arith.addf %204, %205 : vector<4x32xf32>
    %207 = arith.index_cast %c4_i32 : i32 to index
    %c0_55 = arith.constant 0 : index
    %c0_56 = arith.constant 0 : index
    %208 = vector.load %arg8[%207, %c0_55, %c0_56] : memref<8x4x32xf32, #tpu.memory_space<vmem>>, vector<1x4x32xf32>
    %209 = vector.shape_cast %208 : vector<1x4x32xf32> to vector<4x32xf32>
    %210 = vector.shape_cast %206 : vector<4x32xf32> to vector<1x4x32xf32>
    tpu.vector_store %arg8[%207, %c0_55, %c0_56], %210 {strides = array<i32>} : memref<8x4x32xf32, #tpu.memory_space<vmem>>, vector<1x4x32xf32>,
    %c5_i32 = arith.constant 5 : i32
    %211 = arith.index_cast %c5_i32 : i32 to index
    %c0_57 = arith.constant 0 : index
    %c0_58 = arith.constant 0 : index
    %212 = vector.load %arg1[%211, %c0_57, %c0_58] : memref<8x4x16xf32, #tpu.memory_space<vmem>>, vector<1x4x16xf32>
    %213 = vector.shape_cast %212 : vector<1x4x16xf32> to vector<4x16xf32>
    %214 = arith.truncf %213 : vector<4x16xf32> to vector<4x16xbf16>
    %cst_59 = arith.constant dense<0.000000e+00> : vector<4x96xf32>
    %215 = tpu.matmul %214, %3, %cst_59 {dimension_numbers = #tpu.dot_dimension_numbers<[1], [0], [0], [1], [0, 0, 1, 1], [], []>} : vector<4x16xbf16>, vector<16x96xbf16>, vector<4x96xf32> -> vector<4x96xf32>
    %216 = arith.addf %215, %8 : vector<4x96xf32>
    %217 = arith.truncf %206 : vector<4x32xf32> to vector<4x32xbf16>
    %cst_60 = arith.constant dense<0.000000e+00> : vector<4x96xf32>
    %218 = tpu.matmul %217, %4, %cst_60 {dimension_numbers = #tpu.dot_dimension_numbers<[1], [0], [0], [1], [0, 0, 1, 1], [], []>} : vector<4x32xbf16>, vector<32x96xbf16>, vector<4x96xf32> -> vector<4x96xf32>
    %219 = vector.broadcast %9 : vector<1x96xf32> to vector<4x96xf32>
    %220 = arith.addf %218, %219 : vector<4x96xf32>
    %221 = vector.extract_strided_slice %216 {offsets = [0, 0], sizes = [4, 32], strides = [1, 1]} : vector<4x96xf32> to vector<4x32xf32>
    %222 = vector.extract_strided_slice %220 {offsets = [0, 0], sizes = [4, 32], strides = [1, 1]} : vector<4x96xf32> to vector<4x32xf32>
    %223 = arith.addf %221, %222 : vector<4x32xf32>
    %224 = arith.negf %223 : vector<4x32xf32>
    %225 = math.exp %224 : vector<4x32xf32>
    %cst_61 = arith.constant 1.000000e+00 : f32
    %226 = vector.broadcast %cst_61 : f32 to vector<4x32xf32>
    %227 = arith.addf %226, %225 : vector<4x32xf32>
    %228 = arith.divf %226, %227 : vector<4x32xf32>
    %229 = vector.extract_strided_slice %216 {offsets = [0, 32], sizes = [4, 32], strides = [1, 1]} : vector<4x96xf32> to vector<4x32xf32>
    %230 = vector.extract_strided_slice %220 {offsets = [0, 32], sizes = [4, 32], strides = [1, 1]} : vector<4x96xf32> to vector<4x32xf32>
    %231 = arith.addf %229, %230 : vector<4x32xf32>
    %232 = arith.negf %231 : vector<4x32xf32>
    %233 = math.exp %232 : vector<4x32xf32>
    %cst_62 = arith.constant 1.000000e+00 : f32
    %234 = vector.broadcast %cst_62 : f32 to vector<4x32xf32>
    %235 = arith.addf %234, %233 : vector<4x32xf32>
    %236 = arith.divf %234, %235 : vector<4x32xf32>
    %237 = vector.extract_strided_slice %216 {offsets = [0, 64], sizes = [4, 32], strides = [1, 1]} : vector<4x96xf32> to vector<4x32xf32>
    %238 = vector.extract_strided_slice %220 {offsets = [0, 64], sizes = [4, 32], strides = [1, 1]} : vector<4x96xf32> to vector<4x32xf32>
    %239 = arith.mulf %228, %238 : vector<4x32xf32>
    %240 = arith.addf %237, %239 : vector<4x32xf32>
    %241 = math.tanh %240 : vector<4x32xf32>
    %cst_63 = arith.constant 1.000000e+00 : f32
    %242 = vector.broadcast %cst_63 : f32 to vector<4x32xf32>
    %243 = arith.subf %242, %236 : vector<4x32xf32>
    %244 = arith.mulf %243, %241 : vector<4x32xf32>
    %245 = arith.mulf %236, %206 : vector<4x32xf32>
    %246 = arith.addf %244, %245 : vector<4x32xf32>
    %247 = arith.index_cast %c5_i32 : i32 to index
    %c0_64 = arith.constant 0 : index
    %c0_65 = arith.constant 0 : index
    %248 = vector.load %arg8[%247, %c0_64, %c0_65] : memref<8x4x32xf32, #tpu.memory_space<vmem>>, vector<1x4x32xf32>
    %249 = vector.shape_cast %248 : vector<1x4x32xf32> to vector<4x32xf32>
    %250 = vector.shape_cast %246 : vector<4x32xf32> to vector<1x4x32xf32>
    tpu.vector_store %arg8[%247, %c0_64, %c0_65], %250 {strides = array<i32>} : memref<8x4x32xf32, #tpu.memory_space<vmem>>, vector<1x4x32xf32>,
    %c6_i32 = arith.constant 6 : i32
    %251 = arith.index_cast %c6_i32 : i32 to index
    %c0_66 = arith.constant 0 : index
    %c0_67 = arith.constant 0 : index
    %252 = vector.load %arg1[%251, %c0_66, %c0_67] : memref<8x4x16xf32, #tpu.memory_space<vmem>>, vector<1x4x16xf32>
    %253 = vector.shape_cast %252 : vector<1x4x16xf32> to vector<4x16xf32>
    %254 = arith.truncf %253 : vector<4x16xf32> to vector<4x16xbf16>
    %cst_68 = arith.constant dense<0.000000e+00> : vector<4x96xf32>
    %255 = tpu.matmul %254, %3, %cst_68 {dimension_numbers = #tpu.dot_dimension_numbers<[1], [0], [0], [1], [0, 0, 1, 1], [], []>} : vector<4x16xbf16>, vector<16x96xbf16>, vector<4x96xf32> -> vector<4x96xf32>
    %256 = arith.addf %255, %8 : vector<4x96xf32>
    %257 = arith.truncf %246 : vector<4x32xf32> to vector<4x32xbf16>
    %cst_69 = arith.constant dense<0.000000e+00> : vector<4x96xf32>
    %258 = tpu.matmul %257, %4, %cst_69 {dimension_numbers = #tpu.dot_dimension_numbers<[1], [0], [0], [1], [0, 0, 1, 1], [], []>} : vector<4x32xbf16>, vector<32x96xbf16>, vector<4x96xf32> -> vector<4x96xf32>
    %259 = vector.broadcast %9 : vector<1x96xf32> to vector<4x96xf32>
    %260 = arith.addf %258, %259 : vector<4x96xf32>
    %261 = vector.extract_strided_slice %256 {offsets = [0, 0], sizes = [4, 32], strides = [1, 1]} : vector<4x96xf32> to vector<4x32xf32>
    %262 = vector.extract_strided_slice %260 {offsets = [0, 0], sizes = [4, 32], strides = [1, 1]} : vector<4x96xf32> to vector<4x32xf32>
    %263 = arith.addf %261, %262 : vector<4x32xf32>
    %264 = arith.negf %263 : vector<4x32xf32>
    %265 = math.exp %264 : vector<4x32xf32>
    %cst_70 = arith.constant 1.000000e+00 : f32
    %266 = vector.broadcast %cst_70 : f32 to vector<4x32xf32>
    %267 = arith.addf %266, %265 : vector<4x32xf32>
    %268 = arith.divf %266, %267 : vector<4x32xf32>
    %269 = vector.extract_strided_slice %256 {offsets = [0, 32], sizes = [4, 32], strides = [1, 1]} : vector<4x96xf32> to vector<4x32xf32>
    %270 = vector.extract_strided_slice %260 {offsets = [0, 32], sizes = [4, 32], strides = [1, 1]} : vector<4x96xf32> to vector<4x32xf32>
    %271 = arith.addf %269, %270 : vector<4x32xf32>
    %272 = arith.negf %271 : vector<4x32xf32>
    %273 = math.exp %272 : vector<4x32xf32>
    %cst_71 = arith.constant 1.000000e+00 : f32
    %274 = vector.broadcast %cst_71 : f32 to vector<4x32xf32>
    %275 = arith.addf %274, %273 : vector<4x32xf32>
    %276 = arith.divf %274, %275 : vector<4x32xf32>
    %277 = vector.extract_strided_slice %256 {offsets = [0, 64], sizes = [4, 32], strides = [1, 1]} : vector<4x96xf32> to vector<4x32xf32>
    %278 = vector.extract_strided_slice %260 {offsets = [0, 64], sizes = [4, 32], strides = [1, 1]} : vector<4x96xf32> to vector<4x32xf32>
    %279 = arith.mulf %268, %278 : vector<4x32xf32>
    %280 = arith.addf %277, %279 : vector<4x32xf32>
    %281 = math.tanh %280 : vector<4x32xf32>
    %cst_72 = arith.constant 1.000000e+00 : f32
    %282 = vector.broadcast %cst_72 : f32 to vector<4x32xf32>
    %283 = arith.subf %282, %276 : vector<4x32xf32>
    %284 = arith.mulf %283, %281 : vector<4x32xf32>
    %285 = arith.mulf %276, %246 : vector<4x32xf32>
    %286 = arith.addf %284, %285 : vector<4x32xf32>
    %287 = arith.index_cast %c6_i32 : i32 to index
    %c0_73 = arith.constant 0 : index
    %c0_74 = arith.constant 0 : index
    %288 = vector.load %arg8[%287, %c0_73, %c0_74] : memref<8x4x32xf32, #tpu.memory_space<vmem>>, vector<1x4x32xf32>
    %289 = vector.shape_cast %288 : vector<1x4x32xf32> to vector<4x32xf32>
    %290 = vector.shape_cast %286 : vector<4x32xf32> to vector<1x4x32xf32>
    tpu.vector_store %arg8[%287, %c0_73, %c0_74], %290 {strides = array<i32>} : memref<8x4x32xf32, #tpu.memory_space<vmem>>, vector<1x4x32xf32>,
    %c7_i32 = arith.constant 7 : i32
    %291 = arith.index_cast %c7_i32 : i32 to index
    %c0_75 = arith.constant 0 : index
    %c0_76 = arith.constant 0 : index
    %292 = vector.load %arg1[%291, %c0_75, %c0_76] : memref<8x4x16xf32, #tpu.memory_space<vmem>>, vector<1x4x16xf32>
    %293 = vector.shape_cast %292 : vector<1x4x16xf32> to vector<4x16xf32>
    %294 = arith.truncf %293 : vector<4x16xf32> to vector<4x16xbf16>
    %cst_77 = arith.constant dense<0.000000e+00> : vector<4x96xf32>
    %295 = tpu.matmul %294, %3, %cst_77 {dimension_numbers = #tpu.dot_dimension_numbers<[1], [0], [0], [1], [0, 0, 1, 1], [], []>} : vector<4x16xbf16>, vector<16x96xbf16>, vector<4x96xf32> -> vector<4x96xf32>
    %296 = arith.addf %295, %8 : vector<4x96xf32>
    %297 = arith.truncf %286 : vector<4x32xf32> to vector<4x32xbf16>
    %cst_78 = arith.constant dense<0.000000e+00> : vector<4x96xf32>
    %298 = tpu.matmul %297, %4, %cst_78 {dimension_numbers = #tpu.dot_dimension_numbers<[1], [0], [0], [1], [0, 0, 1, 1], [], []>} : vector<4x32xbf16>, vector<32x96xbf16>, vector<4x96xf32> -> vector<4x96xf32>
    %299 = vector.broadcast %9 : vector<1x96xf32> to vector<4x96xf32>
    %300 = arith.addf %298, %299 : vector<4x96xf32>
    %301 = vector.extract_strided_slice %296 {offsets = [0, 0], sizes = [4, 32], strides = [1, 1]} : vector<4x96xf32> to vector<4x32xf32>
    %302 = vector.extract_strided_slice %300 {offsets = [0, 0], sizes = [4, 32], strides = [1, 1]} : vector<4x96xf32> to vector<4x32xf32>
    %303 = arith.addf %301, %302 : vector<4x32xf32>
    %304 = arith.negf %303 : vector<4x32xf32>
    %305 = math.exp %304 : vector<4x32xf32>
    %cst_79 = arith.constant 1.000000e+00 : f32
    %306 = vector.broadcast %cst_79 : f32 to vector<4x32xf32>
    %307 = arith.addf %306, %305 : vector<4x32xf32>
    %308 = arith.divf %306, %307 : vector<4x32xf32>
    %309 = vector.extract_strided_slice %296 {offsets = [0, 32], sizes = [4, 32], strides = [1, 1]} : vector<4x96xf32> to vector<4x32xf32>
    %310 = vector.extract_strided_slice %300 {offsets = [0, 32], sizes = [4, 32], strides = [1, 1]} : vector<4x96xf32> to vector<4x32xf32>
    %311 = arith.addf %309, %310 : vector<4x32xf32>
    %312 = arith.negf %311 : vector<4x32xf32>
    %313 = math.exp %312 : vector<4x32xf32>
    %cst_80 = arith.constant 1.000000e+00 : f32
    %314 = vector.broadcast %cst_80 : f32 to vector<4x32xf32>
    %315 = arith.addf %314, %313 : vector<4x32xf32>
    %316 = arith.divf %314, %315 : vector<4x32xf32>
    %317 = vector.extract_strided_slice %296 {offsets = [0, 64], sizes = [4, 32], strides = [1, 1]} : vector<4x96xf32> to vector<4x32xf32>
    %318 = vector.extract_strided_slice %300 {offsets = [0, 64], sizes = [4, 32], strides = [1, 1]} : vector<4x96xf32> to vector<4x32xf32>
    %319 = arith.mulf %308, %318 : vector<4x32xf32>
    %320 = arith.addf %317, %319 : vector<4x32xf32>
    %321 = math.tanh %320 : vector<4x32xf32>
    %cst_81 = arith.constant 1.000000e+00 : f32
    %322 = vector.broadcast %cst_81 : f32 to vector<4x32xf32>
    %323 = arith.subf %322, %316 : vector<4x32xf32>
    %324 = arith.mulf %323, %321 : vector<4x32xf32>
    %325 = arith.mulf %316, %286 : vector<4x32xf32>
    %326 = arith.addf %324, %325 : vector<4x32xf32>
    %327 = arith.index_cast %c7_i32 : i32 to index
    %c0_82 = arith.constant 0 : index
    %c0_83 = arith.constant 0 : index
    %328 = vector.load %arg8[%327, %c0_82, %c0_83] : memref<8x4x32xf32, #tpu.memory_space<vmem>>, vector<1x4x32xf32>
    %329 = vector.shape_cast %328 : vector<1x4x32xf32> to vector<4x32xf32>
    %330 = vector.shape_cast %326 : vector<4x32xf32> to vector<1x4x32xf32>
    tpu.vector_store %arg8[%327, %c0_82, %c0_83], %330 {strides = array<i32>} : memref<8x4x32xf32, #tpu.memory_space<vmem>>, vector<1x4x32xf32>,
    %c8_i32 = arith.constant 8 : i32
    %c0_84 = arith.constant 0 : index
    %c0_85 = arith.constant 0 : index
    %331 = vector.load %arg9[%c0_84, %c0_85] : memref<4x32xf32, #tpu.memory_space<vmem>>, vector<4x32xf32>
    tpu.vector_store %arg9[%c0_84, %c0_85], %326 {strides = array<i32>} : memref<4x32xf32, #tpu.memory_space<vmem>>, vector<4x32xf32>,
    return
  }
  func.func @transform_0(%arg0: i32) -> (i32, i32, i32) {
    %c0_i32 = arith.constant 0 : i32
    %c0_i32_0 = arith.constant 0 : i32
    %c0_i32_1 = arith.constant 0 : i32
    return %arg0, %c0_i32, %c0_i32_0 : i32, i32, i32
  }
  func.func @transform_1(%arg0: i32) -> (i32, i32) {
    %c0_i32 = arith.constant 0 : i32
    %c0_i32_0 = arith.constant 0 : i32
    %c0_i32_1 = arith.constant 0 : i32
    return %c0_i32, %c0_i32_0 : i32, i32
  }
  func.func @transform_2(%arg0: i32) -> (i32, i32) {
    %c0_i32 = arith.constant 0 : i32
    %c0_i32_0 = arith.constant 0 : i32
    %c0_i32_1 = arith.constant 0 : i32
    return %c0_i32, %c0_i32_0 : i32, i32
  }
  func.func @transform_3(%arg0: i32) -> (i32, i32) {
    %c0_i32 = arith.constant 0 : i32
    %c0_i32_0 = arith.constant 0 : i32
    %c0_i32_1 = arith.constant 0 : i32
    return %c0_i32, %c0_i32_0 : i32, i32
  }
  func.func @transform_4(%arg0: i32) -> (i32, i32) {
    %c0_i32 = arith.constant 0 : i32
    %c0_i32_0 = arith.constant 0 : i32
    %c0_i32_1 = arith.constant 0 : i32
    return %c0_i32, %c0_i32_0 : i32, i32
  }
  func.func @transform_5(%arg0: i32) -> (i32, i32) {
    %c0_i32 = arith.constant 0 : i32
    %c0_i32_0 = arith.constant 0 : i32
    %c0_i32_1 = arith.constant 0 : i32
    return %c0_i32, %c0_i32_0 : i32, i32
  }
  func.func @transform_6(%arg0: i32) -> (i32, i32) {
    %c0_i32 = arith.constant 0 : i32
    %c0_i32_0 = arith.constant 0 : i32
    %c0_i32_1 = arith.constant 0 : i32
    return %c0_i32, %c0_i32_0 : i32, i32
  }
  func.func @transform_7(%arg0: i32) -> (i32, i32, i32) {
    %c0_i32 = arith.constant 0 : i32
    %c0_i32_0 = arith.constant 0 : i32
    %c0_i32_1 = arith.constant 0 : i32
    return %arg0, %c0_i32, %c0_i32_0 : i32, i32, i32
  }
}

</mosaic_0001>

<bundles_post_ra>
// kernel: encoder_decoder_forward.9
= control target key start
LH: loop header
LB: loop body
LE: loop exit
PB: predicated region body
PF: predicated region fallthrough
CT: control target
= control target key end

     0   :  { %vm44_vm0 = vcmask 261120   ;;  %s180_s1 = inlined_call_operand.vmem [shape: bf16[32,128], index: 1, kind: input, shape index: {}]   ;;  %s181_s0 = inlined_call_operand.vmem [shape: f32[32,32], index: 0, kind: input, shape index: {}]   ;;  %s182_s2 = inlined_call_operand.vmem [shape: f32[1,128], index: 2, kind: input, shape index: {}]   ;;  %s183_s3 = inlined_call_operand.vmem [shape: f32[32,128], index: 3, kind: output, shape index: {}]  }
   0x1   :  { %v125_v0 = vld [vmem:[%s180_s1] sm:$0xff]   ;;  %v126_v1 = vld [vmem:[%s180_s1 + $0x8] sm:$0xff]   ;;  %v17_v5 = vld [vmem:[%s181_s0 + $0x10] sm:$0xff] }
   0x2   :  { %117 = vmatprep.subr.bf16.mxu0 %v125_v0  ;;  %v15_v2 = vld [vmem:[%s181_s0] sm:$0xff]  ;;  %v16_v3 = vld [vmem:[%s181_s0 + $0x8] sm:$0xff]  ;;  %v18_v6 = vld [vmem:[%s181_s0 + $0x18] sm:$0xff] }
   0x3   :  { %118 = vmatpush3.bf16.msra.mxu0 %v125_v0  ;;  %v19_v4 = vpack.c.bf16 %v16_v3, %v15_v2  ;;  %v20_v7 = vpack.c.bf16 %v18_v6, %v17_v5  ;;  %v108_v8 = vld [vmem:[%s182_s2] ss:$0 sm:$0xff] }
   0x4   :  { %119 = vmatprep.subr.bf16.mxu0 %v126_v1 }
   0x5   :  { %121 = vmatprep.mubr.msk.bf16.mxu0 %vm44_vm0, %v19_v4 }
   0x7   :  { %120 = vmatpush3.bf16.msra.mxu0 %v126_v1 }
   0xa   :  { %122 = vmatmul.mubr.msk.bf16.vlgmr.msra.gmra.mrb[0].mxu0 %vm44_vm0, %v20_v7 }
  0xdd   :  { %v123_v9 = vpop.f32.mrb[0].mxu0 }
  0xde   :  { %v94_v10 = vadd.f32 %v123_v9, %v108_v8  ;;  %v85_v11 = vpop.f32.mrb[1].mxu0 }
  0xdf   :  { %v86_v12 = vadd.f32 %v108_v8, %v85_v11  ;;  %v124_v13 = vpop.f32.mrb[2].mxu0 }
  0xe0   :  { %102 = vst [vmem:[%s183_s3 + $0x10] sm:$0xff] %v94_v10  ;;  %v97_v14 = vadd.f32 %v124_v13, %v108_v8  ;;  %v88_v15 = vpop.f32.mrb[3].mxu0 }
  0xe1   :  { %100 = vst [vmem:[%s183_s3] sm:$0xff] %v86_v12  ;;  %v89_v16 = vadd.f32 %v108_v8, %v88_v15 }
  0xe2   :  { %103 = vst [vmem:[%s183_s3 + $0x18] sm:$0xff] %v97_v14 }
  0xe3   :  { %101 = vst [vmem:[%s183_s3 + $0x8] sm:$0xff] %v89_v16 }

// kernel: encoder_decoder_forward.6
= control target key start
LH: loop header
LB: loop body
LE: loop exit
PB: predicated region body
PF: predicated region fallthrough
CT: control target
= control target key end

     0   :  { %v1366_v0 = vmov 0.0   ;;  %vm1367_vm0 = vmmov 0   ;;  %vm32_vm1 = vcmask 257024   ;;  %vm67_vm2 = vcmask 261120   ;;  %s1708_s3 = inlined_call_operand.vmem [shape: bf16[32,96], index: 3, kind: input, shape index: {}]   ;;  %s1709_s4 = inlined_call_operand.vmem [shape: bf16[32,96], index: 4, kind: input, shape index: {}]   ;;  %s1710_s0 = inlined_call_operand.vmem [shape: f32[8,4,32], index: 0, kind: input, shape index: {}]   ;;  %s1711_s2 = inlined_call_operand.vmem [shape: f32[4,32], index: 2, kind: input, shape index: {}]   ;;  %s1712_s6 = inlined_call_operand.vmem [shape: f32[1,96], index: 6, kind: input, shape index: {}]   ;;  %s1713_s1 = inlined_call_operand.vmem [shape: f32[4,96], index: 1, kind: input, shape index: {}]   ;;  %s1714_s5 = inlined_call_operand.vmem [shape: f32[1,96], index: 5, kind: input, shape index: {}]   ;;  %s1715_s7 = inlined_call_operand.vmem [shape: f32[8,4,32], index: 7, kind: output, shape index: {}]  }
   0x1   :  { %1181 = vmatprep.subr.bf16.mxu0 %v1366_v0  ;;  %1189 = vmatprep.subr.bf16.mxu1 %v1366_v0  ;;  %v1416_v1 = vld [vmem:[%s1708_s3] sm:$0xff]   ;;  %v1431_v3 = vld [vmem:[%s1708_s3 + $0x8] sm:$0xff]  }
   0x2   :  { %v1421_v2 = vld [vmem:[%s1709_s4] sm:$0xff]   ;;  %1185 = vmatprep.mubr.msk.bf16.mxu0 %vm1367_vm0, %v1366_v0  ;;  %1193 = vmatprep.mubr.msk.bf16.mxu1 %vm1367_vm0, %v1366_v0  ;;  %v1438_v4 = vld [vmem:[%s1709_s4 + $0x8] sm:$0xff]   ;;  %s1368_s4 = smov 64  }
   0x3   :  { %1182 = vmatpush3.bf16.msra.mxu0 %v1416_v1  ;;  %1190 = vmatpush3.bf16.msra.mxu1 %v1421_v2  ;;  %v53_v5 = vld [vmem:[%s1710_s0] sm:$0xf]  ;;  %v1098_v34 = vld [vmem:[%s1710_s0 + $0x4] sm:$0xf] }
   0x4   :  { %1183 = vmatprep.subr.bf16.mxu0 %v1366_v0  ;;  %1191 = vmatprep.subr.bf16.mxu1 %v1366_v0  ;;  %v31_v6 = vld [vmem:[%s1711_s2] sm:$0xf]  ;;  %v54_v7 = vpack.c.bf16 %v53_v5, %v53_v5  ;;  %v211_v35 = vpack.c.bf16 %v1098_v34, %v1098_v34  ;;  %v1103_v5 = vld [vmem:[%s1710_s0 + $0x8] sm:$0xf] }
   0x5   :  { %33 = vst.msk [vmem:[#allocation2] sm:$0xf] %vm32_vm1, %v31_v6  ;;  %v1469_v14 = vld [vmem:[%s1712_s6] ss:$0 sm:$0xff]  ;;  %v336_v6 = vpack.c.bf16 %v1103_v5, %v1103_v5 }
   0x6   :  { %v42_v20 = vld [vmem:[%s1713_s1] sm:$0xf]  ;;  %s1369_s1 = smov 96  }
   0x7   :  { %1184 = vmatpush3.bf16.msra.mxu0 %v1431_v3  ;;  %1192 = vmatpush3.bf16.msra.mxu1 %v1438_v4  ;;  %v1089_v21 = vld [vmem:[%s1714_s5] ss:$0 sm:$0xff]  ;;  %s1370_s5 = smov 32  }
   0x8   :  { %1197 = vmatprep.subr.bf16.mxu0 %v1366_v0  ;;  %1205 = vmatprep.subr.bf16.mxu1 %v1366_v0  ;;  %v1479_v22 = vadd.f32 %v1089_v21, %v42_v20 }
   0xa   :  { %1186 = vmatmul.mubr.msk.bf16.vlgmr.msra.gmra.mrb[0].mxu0 %vm67_vm2, %v54_v7 }
   0xb   :  { %1198 = vmatpush3.bf16.msra.mxu0 %v1416_v1  ;;  %1201 = vmatprep.mubr.msk.bf16.mxu0 %vm1367_vm0, %v1366_v0 }
   0xc   :  { %1199 = vmatprep.subr.bf16.mxu0 %v1366_v0  ;;  %v52_v8 = vld [vmem:[#allocation2] sm:$0xf] }
   0xd   :  { %v111_v9 = vpack.c.bf16 %v52_v8, %v52_v8 }
   0xf   :  { %1200 = vmatpush3.bf16.msra.mxu0 %v1431_v3  ;;  %1194 = vmatmul.mubr.msk.bf16.vlgmr.msra.gmra.mrb[0].mxu1 %vm67_vm2, %v111_v9 }
  0x10   :  { %1213 = vmatprep.subr.bf16.mxu0 %v1366_v0  ;;  %1206 = vmatpush3.bf16.msra.mxu1 %v1421_v2 }
  0x11   :  { %1209 = vmatprep.mubr.msk.bf16.mxu1 %vm1367_vm0, %v1366_v0  ;;  %1207 = vmatprep.subr.bf16.mxu1 %v1366_v0 }
  0x12   :  { %1202 = vmatmul.mubr.msk.bf16.vlgmr.msra.gmra.mrb[4].mxu0 %vm67_vm2, %v211_v35 }
  0x13   :  { %1214 = vmatpush3.bf16.msra.mxu0 %v1416_v1  ;;  %1217 = vmatprep.mubr.msk.bf16.mxu0 %vm1367_vm0, %v1366_v0 }
  0x14   :  { %1208 = vmatpush3.bf16.msra.mxu1 %v1438_v4  ;;  %1215 = vmatprep.subr.bf16.mxu0 %v1366_v0 }
  0x15   :  { %1221 = vmatprep.subr.bf16.mxu1 %v1366_v0 }
  0x17   :  { %1216 = vmatpush3.bf16.msra.mxu0 %v1431_v3 }
  0x18   :  { %1229 = vmatprep.subr.bf16.mxu0 %v1366_v0 }
  0x1a   :  { %1218 = vmatmul.mubr.msk.bf16.vlgmr.msra.gmra.mrb[8].mxu0 %vm67_vm2, %v336_v6 }
  0x1b   :  { %1230 = vmatpush3.bf16.msra.mxu0 %v1416_v1  ;;  %1233 = vmatprep.mubr.msk.bf16.mxu0 %vm1367_vm0, %v1366_v0 }
  0x1c   :  { %1231 = vmatprep.subr.bf16.mxu0 %v1366_v0 }
  0x1f   :  { %1232 = vmatpush3.bf16.msra.mxu0 %v1431_v3 }
  0x20   :  { %1245 = vmatprep.subr.bf16.mxu0 %v1366_v0 }
  0xdd   :  { %v105_v10 = vpop.f32.mrb[0].mxu0 }
  0xde   :  { %v1187_v11 = vpop.f32.mrb[1].mxu0  ;;  %v106_v23 = vadd.f32 %v105_v10, %v1479_v22 }
  0xdf   :  { %v108_v12 = vpop.f32.mrb[2].mxu0 }
  0xe0   :  { %v1188_v13 = vpop.f32.mrb[3].mxu0 }
  0xe2   :  { %v167_v15 = vpop.f32.mrb[0].mxu1 }
  0xe3   :  { %v168_v16 = vadd.f32 %v1469_v14, %v167_v15  ;;  %v1195_v17 = vpop.f32.mrb[1].mxu1 }
  0xe4   :  { %v170_v18 = vpop.f32.mrb[2].mxu1 }
  0xe5   :  { %181 = vrot.lane.b32.xlu0 %v168_v16, %s1368_s4  ;;  %v1196_v19 = vpop.f32.mrb[3].mxu1  ;;  %v173_v24 = vadd.f32 %v168_v16, %v106_v23  ;;  %v249_v44 = vpop.f32.mrb[4].mxu0 }
  0xe6   :  { %v1203_v45 = vpop.f32.mrb[5].mxu0  ;;  %v250_v53 = vadd.f32 %v249_v44, %v1479_v22 }
  0xe7   :  { %v1097_v25 = vmul.f32 -1.442695, %v173_v24  ;;  %v252_v46 = vpop.f32.mrb[6].mxu0 }
  0xe8   :  { %v1204_v47 = vpop.f32.mrb[7].mxu0 }
  0xe9   :  { %1318 = vpow2.f32 %v1097_v25 }
  0xed   :  { %v374_v15 = vpop.f32.mrb[8].mxu0 }
  0xee   :  { %v1219_v16 = vpop.f32.mrb[9].mxu0  ;;  %v375_v25 = vadd.f32 %v374_v15, %v1479_v22 }
  0xef   :  { %v377_v17 = vpop.f32.mrb[10].mxu0 }
  0xf0   :  { %v1220_v18 = vpop.f32.mrb[11].mxu0 }
  0xf3   :  { %v1319_v26 = vpop.eup %1318 }
  0xf4   :  { %v177_v27 = vadd.f32 1.0, %v1319_v26 }
  0xf6   :  { %1320 = vrcp.f32 %v177_v27 }
 0x100   :  { %v1321_v28 = vpop.eup %1320 }
 0x101   :  { %v191_v37 = vsub.f32 1.0, %v1321_v28 }
 0x157   :  { %v182_v29 = vpop.permute.xlu0 %181 }
 0x158   :  { %v184_v30 = vmul.f32 %v1321_v28, %v182_v29 }
 0x15a   :  { %186 = vrot.lane.b32.xlu0 %v184_v30, %s1368_s4 }
 0x1cc   :  { %v187_v31 = vpop.permute.xlu0 %186 }
 0x1cd   :  { %v189_v32 = vadd.f32 %v187_v31, %v106_v23 }
 0x1cf   :  { %1322 = vtanh.f32 %v189_v32 }
 0x1d9   :  { %v1323_v33 = vpop.eup %1322 }
 0x1da   :  { %193 = vrot.lane.b32.xlu1 %v1323_v33, %s1369_s1 }
 0x1de   :  { %198 = vrot.lane.b32.xlu1 %v52_v8, %s1370_s5 }
 0x24c   :  { %v194_v36 = vpop.permute.xlu1 %193 }
 0x24d   :  { %v196_v39 = vmul.f32 %v194_v36, %v191_v37  ;;  %v1108_v36 = vld [vmem:[%s1710_s0 + $0xc] sm:$0xf] }
 0x24e   :  { %v461_v37 = vpack.c.bf16 %v1108_v36, %v1108_v36 }
 0x250   :  { %v199_v38 = vpop.permute.xlu1 %198  ;;  %1234 = vmatmul.mubr.msk.bf16.vlgmr.msra.gmra.mrb[12].mxu0 %vm67_vm2, %v461_v37 }
 0x251   :  { %v201_v40 = vmul.f32 %v1321_v28, %v199_v38  ;;  %1246 = vmatpush3.bf16.msra.mxu0 %v1416_v1  ;;  %1249 = vmatprep.mubr.msk.bf16.mxu0 %vm1367_vm0, %v1366_v0 }
 0x252   :  { %1247 = vmatprep.subr.bf16.mxu0 %v1366_v0 }
 0x253   :  { %v1494_v41 = vadd.f32 %v201_v40, %v196_v39 }
 0x255   :  { %v255_v42 = vpack.c.bf16 %v1494_v41, %v1494_v41  ;;  %1248 = vmatpush3.bf16.msra.mxu0 %v1431_v3 }
 0x256   :  { %1261 = vmatprep.subr.bf16.mxu0 %v1366_v0 }
 0x257   :  { %257 = vrot.lane.b32.xlu0 %v255_v42, %s1369_s1 }
 0x2c9   :  { %v258_v43 = vpop.permute.xlu0 %257 }
 0x2ca   :  { %1210 = vmatmul.mubr.msk.bf16.vlgmr.msra.gmra.mrb[4].mxu1 %vm67_vm2, %v258_v43 }
 0x2cb   :  { %1222 = vmatpush3.bf16.msra.mxu1 %v1421_v2  ;;  %1225 = vmatprep.mubr.msk.bf16.mxu1 %vm1367_vm0, %v1366_v0 }
 0x2cc   :  { %1223 = vmatprep.subr.bf16.mxu1 %v1366_v0 }
 0x2cf   :  { %1224 = vmatpush3.bf16.msra.mxu1 %v1438_v4 }
 0x2d0   :  { %1237 = vmatprep.subr.bf16.mxu1 %v1366_v0 }
 0x323   :  { %v499_v46 = vpop.f32.mrb[12].mxu0 }
 0x324   :  { %v1235_v47 = vpop.f32.mrb[13].mxu0 }
 0x39d   :  { %v296_v48 = vpop.f32.mrb[4].mxu1 }
 0x39e   :  { %v297_v49 = vadd.f32 %v1469_v14, %v296_v48  ;;  %v1211_v50 = vpop.f32.mrb[5].mxu1  ;;  %v502_v48 = vpop.f32.mrb[14].mxu0 }
 0x39f   :  { %v299_v51 = vpop.f32.mrb[6].mxu1 }
 0x3a0   :  { %310 = vrot.lane.b32.xlu1 %v297_v49, %s1368_s4  ;;  %v1212_v52 = vpop.f32.mrb[7].mxu1  ;;  %v302_v54 = vadd.f32 %v297_v49, %v250_v53  ;;  %v1236_v49 = vpop.f32.mrb[15].mxu0 }
 0x3a2   :  { %v1101_v55 = vmul.f32 -1.442695, %v302_v54 }
 0x3a4   :  { %1324 = vpow2.f32 %v1101_v55  ;;  %v500_v55 = vadd.f32 %v499_v46, %v1479_v22 }
 0x3ae   :  { %v1325_v56 = vpop.eup %1324 }
 0x3af   :  { %v306_v57 = vadd.f32 1.0, %v1325_v56 }
 0x3b1   :  { %1326 = vrcp.f32 %v306_v57 }
 0x3bb   :  { %v1327_v58 = vpop.eup %1326 }
 0x3bc   :  { %v320_v7 = vsub.f32 1.0, %v1327_v58  ;;  %v326_v9 = vmul.f32 %v1327_v58, %v1494_v41 }
 0x412   :  { %v311_v59 = vpop.permute.xlu1 %310 }
 0x413   :  { %v313_v60 = vmul.f32 %v1327_v58, %v311_v59 }
 0x415   :  { %315 = vrot.lane.b32.xlu0 %v313_v60, %s1368_s4 }
 0x487   :  { %v316_v61 = vpop.permute.xlu0 %315 }
 0x488   :  { %v318_v62 = vadd.f32 %v316_v61, %v250_v53 }
 0x48a   :  { %1328 = vtanh.f32 %v318_v62 }
 0x494   :  { %v1329_v63 = vpop.eup %1328 }
 0x495   :  { %322 = vrot.lane.b32.xlu1 %v1329_v63, %s1369_s1 }
 0x507   :  { %v323_v8 = vpop.permute.xlu1 %322 }
 0x508   :  { %v325_v10 = vmul.f32 %v323_v8, %v320_v7  ;;  %v1113_v7 = vld [vmem:[%s1710_s0 + $0x10] sm:$0xf] }
 0x509   :  { %v586_v8 = vpack.c.bf16 %v1113_v7, %v1113_v7 }
 0x50a   :  { %v1522_v11 = vadd.f32 %v326_v9, %v325_v10 }
 0x50b   :  { %1250 = vmatmul.mubr.msk.bf16.vlgmr.msra.gmra.mrb[16].mxu0 %vm67_vm2, %v586_v8 }
 0x50c   :  { %v380_v12 = vpack.c.bf16 %v1522_v11, %v1522_v11  ;;  %1262 = vmatpush3.bf16.msra.mxu0 %v1416_v1  ;;  %1265 = vmatprep.mubr.msk.bf16.mxu0 %vm1367_vm0, %v1366_v0 }
 0x50d   :  { %1263 = vmatprep.subr.bf16.mxu0 %v1366_v0 }
 0x50e   :  { %382 = vrot.lane.b32.xlu0 %v380_v12, %s1369_s1 }
 0x510   :  { %1264 = vmatpush3.bf16.msra.mxu0 %v1431_v3 }
 0x511   :  { %1277 = vmatprep.subr.bf16.mxu0 %v1366_v0 }
 0x580   :  { %v383_v13 = vpop.permute.xlu0 %382 }
 0x581   :  { %1226 = vmatmul.mubr.msk.bf16.vlgmr.msra.gmra.mrb[8].mxu1 %vm67_vm2, %v383_v13 }
 0x582   :  { %1238 = vmatpush3.bf16.msra.mxu1 %v1421_v2  ;;  %1241 = vmatprep.mubr.msk.bf16.mxu1 %vm1367_vm0, %v1366_v0 }
 0x583   :  { %1239 = vmatprep.subr.bf16.mxu1 %v1366_v0 }
 0x586   :  { %1240 = vmatpush3.bf16.msra.mxu1 %v1438_v4 }
 0x587   :  { %1253 = vmatprep.subr.bf16.mxu1 %v1366_v0 }
 0x5de   :  { %v624_v18 = vpop.f32.mrb[16].mxu0 }
 0x654   :  { %v421_v19 = vpop.f32.mrb[8].mxu1 }
 0x655   :  { %v422_v20 = vadd.f32 %v1469_v14, %v421_v19  ;;  %v1227_v21 = vpop.f32.mrb[9].mxu1  ;;  %v1251_v19 = vpop.f32.mrb[17].mxu0 }
 0x656   :  { %v424_v23 = vpop.f32.mrb[10].mxu1 }
 0x657   :  { %435 = vrot.lane.b32.xlu1 %v422_v20, %s1368_s4  ;;  %v1228_v24 = vpop.f32.mrb[11].mxu1  ;;  %v427_v26 = vadd.f32 %v422_v20, %v375_v25  ;;  %v627_v20 = vpop.f32.mrb[18].mxu0 }
 0x658   :  { %v1252_v21 = vpop.f32.mrb[19].mxu0 }
 0x659   :  { %v1106_v27 = vmul.f32 -1.442695, %v427_v26 }
 0x65b   :  { %1330 = vpow2.f32 %v1106_v27 }
 0x665   :  { %v1331_v28 = vpop.eup %1330 }
 0x666   :  { %v431_v29 = vadd.f32 1.0, %v1331_v28  ;;  %v625_v28 = vadd.f32 %v624_v18, %v1479_v22 }
 0x668   :  { %1332 = vrcp.f32 %v431_v29 }
 0x672   :  { %v1333_v30 = vpop.eup %1332 }
 0x673   :  { %v445_v38 = vsub.f32 1.0, %v1333_v30  ;;  %v451_v40 = vmul.f32 %v1333_v30, %v1522_v11 }
 0x6c9   :  { %v436_v31 = vpop.permute.xlu1 %435 }
 0x6ca   :  { %v438_v32 = vmul.f32 %v1333_v30, %v436_v31 }
 0x6cc   :  { %440 = vrot.lane.b32.xlu0 %v438_v32, %s1368_s4 }
 0x73e   :  { %v441_v33 = vpop.permute.xlu0 %440 }
 0x73f   :  { %v443_v34 = vadd.f32 %v441_v33, %v375_v25 }
 0x741   :  { %1334 = vtanh.f32 %v443_v34 }
 0x74b   :  { %v1335_v35 = vpop.eup %1334 }
 0x74c   :  { %447 = vrot.lane.b32.xlu1 %v1335_v35, %s1369_s1 }
 0x7be   :  { %v448_v39 = vpop.permute.xlu1 %447 }
 0x7bf   :  { %v450_v42 = vmul.f32 %v448_v39, %v445_v38  ;;  %v1118_v39 = vld [vmem:[%s1710_s0 + $0x14] sm:$0xf] }
 0x7c1   :  { %v1550_v43 = vadd.f32 %v451_v40, %v450_v42  ;;  %v711_v40 = vpack.c.bf16 %v1118_v39, %v1118_v39  ;;  %v1128_v39 = vld [vmem:[%s1710_s0 + $0x1c] sm:$0xf] }
 0x7c3   :  { %v505_v44 = vpack.c.bf16 %v1550_v43, %v1550_v43  ;;  %1266 = vmatmul.mubr.msk.bf16.vlgmr.msra.gmra.mrb[20].mxu0 %vm67_vm2, %v711_v40  ;;  %v961_v40 = vpack.c.bf16 %v1128_v39, %v1128_v39 }
 0x7c4   :  { %1278 = vmatpush3.bf16.msra.mxu0 %v1416_v1  ;;  %1281 = vmatprep.mubr.msk.bf16.mxu0 %vm1367_vm0, %v1366_v0 }
 0x7c5   :  { %507 = vrot.lane.b32.xlu0 %v505_v44, %s1369_s1  ;;  %1279 = vmatprep.subr.bf16.mxu0 %v1366_v0 }
 0x7c8   :  { %1280 = vmatpush3.bf16.msra.mxu0 %v1431_v3 }
 0x7c9   :  { %1293 = vmatprep.subr.bf16.mxu0 %v1366_v0 }
 0x837   :  { %v508_v45 = vpop.permute.xlu0 %507 }
 0x838   :  { %1242 = vmatmul.mubr.msk.bf16.vlgmr.msra.gmra.mrb[12].mxu1 %vm67_vm2, %v508_v45 }
 0x839   :  { %1254 = vmatpush3.bf16.msra.mxu1 %v1421_v2  ;;  %1257 = vmatprep.mubr.msk.bf16.mxu1 %vm1367_vm0, %v1366_v0 }
 0x83a   :  { %1255 = vmatprep.subr.bf16.mxu1 %v1366_v0 }
 0x83d   :  { %1256 = vmatpush3.bf16.msra.mxu1 %v1438_v4 }
 0x83e   :  { %1269 = vmatprep.subr.bf16.mxu1 %v1366_v0 }
 0x90b   :  { %v546_v50 = vpop.f32.mrb[12].mxu1 }
 0x90c   :  { %v547_v51 = vadd.f32 %v1469_v14, %v546_v50  ;;  %v1243_v52 = vpop.f32.mrb[13].mxu1  ;;  %v749_v50 = vpop.f32.mrb[20].mxu0 }
 0x90d   :  { %v549_v53 = vpop.f32.mrb[14].mxu1 }
 0x90e   :  { %560 = vrot.lane.b32.xlu1 %v547_v51, %s1368_s4  ;;  %v1244_v54 = vpop.f32.mrb[15].mxu1  ;;  %v552_v56 = vadd.f32 %v547_v51, %v500_v55  ;;  %v1267_v51 = vpop.f32.mrb[21].mxu0 }
 0x90f   :  { %v752_v52 = vpop.f32.mrb[22].mxu0 }
 0x910   :  { %v1111_v57 = vmul.f32 -1.442695, %v552_v56  ;;  %v1268_v53 = vpop.f32.mrb[23].mxu0 }
 0x912   :  { %1336 = vpow2.f32 %v1111_v57 }
 0x91c   :  { %v1337_v58 = vpop.eup %1336 }
 0x91d   :  { %v556_v59 = vadd.f32 1.0, %v1337_v58 }
 0x91f   :  { %1338 = vrcp.f32 %v556_v59  ;;  %v750_v59 = vadd.f32 %v749_v50, %v1479_v22 }
 0x929   :  { %v1339_v60 = vpop.eup %1338 }
 0x92a   :  { %v570_v9 = vsub.f32 1.0, %v1339_v60  ;;  %v576_v12 = vmul.f32 %v1339_v60, %v1550_v43 }
 0x980   :  { %v561_v61 = vpop.permute.xlu1 %560 }
 0x981   :  { %v563_v62 = vmul.f32 %v1339_v60, %v561_v61 }
 0x983   :  { %565 = vrot.lane.b32.xlu0 %v563_v62, %s1368_s4 }
 0x9f5   :  { %v566_v63 = vpop.permute.xlu0 %565 }
 0x9f6   :  { %v568_v5 = vadd.f32 %v566_v63, %v500_v55 }
 0x9f8   :  { %1340 = vtanh.f32 %v568_v5 }
 0xa02   :  { %v1341_v6 = vpop.eup %1340 }
 0xa03   :  { %572 = vrot.lane.b32.xlu1 %v1341_v6, %s1369_s1 }
 0xa75   :  { %v573_v10 = vpop.permute.xlu1 %572 }
 0xa76   :  { %v575_v13 = vmul.f32 %v573_v10, %v570_v9 }
 0xa78   :  { %v1578_v15 = vadd.f32 %v576_v12, %v575_v13  ;;  %v1123_v12 = vld [vmem:[%s1710_s0 + $0x18] sm:$0xf] }
 0xa79   :  { %v836_v13 = vpack.c.bf16 %v1123_v12, %v1123_v12 }
 0xa7a   :  { %v630_v16 = vpack.c.bf16 %v1578_v15, %v1578_v15 }
 0xa7b   :  { %1282 = vmatmul.mubr.msk.bf16.vlgmr.msra.gmra.mrb[24].mxu0 %vm67_vm2, %v836_v13 }
 0xa7c   :  { %632 = vrot.lane.b32.xlu0 %v630_v16, %s1369_s1  ;;  %1294 = vmatpush3.bf16.msra.mxu0 %v1416_v1 }
 0xa7d   :  { %1297 = vmatprep.mubr.msk.bf16.mxu0 %vm1367_vm0, %v1366_v0  ;;  %1295 = vmatprep.subr.bf16.mxu0 %v1366_v0 }
 0xa80   :  { %1296 = vmatpush3.bf16.msra.mxu0 %v1431_v3 }
 0xa83   :  { %1298 = vmatmul.mubr.msk.bf16.vlgmr.msra.gmra.mrb[28].mxu0 %vm67_vm2, %v961_v40 }
 0xaee   :  { %v633_v17 = vpop.permute.xlu0 %632 }
 0xaef   :  { %1258 = vmatmul.mubr.msk.bf16.vlgmr.msra.gmra.mrb[16].mxu1 %vm67_vm2, %v633_v17 }
 0xaf0   :  { %1270 = vmatpush3.bf16.msra.mxu1 %v1421_v2  ;;  %1273 = vmatprep.mubr.msk.bf16.mxu1 %vm1367_vm0, %v1366_v0 }
 0xaf1   :  { %1271 = vmatprep.subr.bf16.mxu1 %v1366_v0 }
 0xaf4   :  { %1272 = vmatpush3.bf16.msra.mxu1 %v1438_v4 }
 0xaf5   :  { %1285 = vmatprep.subr.bf16.mxu1 %v1366_v0 }
 0xb4e   :  { %v874_v3 = vpop.f32.mrb[24].mxu0 }
 0xbc2   :  { %v671_v23 = vpop.f32.mrb[16].mxu1 }
 0xbc3   :  { %v672_v24 = vadd.f32 %v1469_v14, %v671_v23  ;;  %v1259_v25 = vpop.f32.mrb[17].mxu1  ;;  %v1283_v23 = vpop.f32.mrb[25].mxu0 }
 0xbc4   :  { %v674_v26 = vpop.f32.mrb[18].mxu1 }
 0xbc5   :  { %685 = vrot.lane.b32.xlu1 %v672_v24, %s1368_s4  ;;  %v1260_v27 = vpop.f32.mrb[19].mxu1  ;;  %v677_v29 = vadd.f32 %v672_v24, %v625_v28  ;;  %v877_v24 = vpop.f32.mrb[26].mxu0 }
 0xbc6   :  { %v1284_v25 = vpop.f32.mrb[27].mxu0 }
 0xbc7   :  { %v1116_v30 = vmul.f32 -1.442695, %v677_v29  ;;  %v999_v51 = vpop.f32.mrb[28].mxu0 }
 0xbc8   :  { %v1299_v52 = vpop.f32.mrb[29].mxu0 }
 0xbc9   :  { %1342 = vpow2.f32 %v1116_v30  ;;  %v1002_v53 = vpop.f32.mrb[30].mxu0 }
 0xbd3   :  { %v1343_v31 = vpop.eup %1342 }
 0xbd4   :  { %v681_v32 = vadd.f32 1.0, %v1343_v31 }
 0xbd6   :  { %1344 = vrcp.f32 %v681_v32 }
 0xbe0   :  { %v1345_v33 = vpop.eup %1344 }
 0xbe1   :  { %v695_v42 = vsub.f32 1.0, %v1345_v33  ;;  %v701_v45 = vmul.f32 %v1345_v33, %v1578_v15 }
 0xc37   :  { %v686_v34 = vpop.permute.xlu1 %685 }
 0xc38   :  { %v688_v35 = vmul.f32 %v1345_v33, %v686_v34 }
 0xc3a   :  { %690 = vrot.lane.b32.xlu0 %v688_v35, %s1368_s4 }
 0xcac   :  { %v691_v36 = vpop.permute.xlu0 %690 }
 0xcad   :  { %v693_v37 = vadd.f32 %v691_v36, %v625_v28 }
 0xcaf   :  { %1346 = vtanh.f32 %v693_v37 }
 0xcb9   :  { %v1347_v38 = vpop.eup %1346 }
 0xcba   :  { %697 = vrot.lane.b32.xlu1 %v1347_v38, %s1369_s1 }
 0xd2c   :  { %v698_v44 = vpop.permute.xlu1 %697 }
 0xd2d   :  { %v700_v46 = vmul.f32 %v698_v44, %v695_v42 }
 0xd2f   :  { %v1606_v47 = vadd.f32 %v701_v45, %v700_v46 }
 0xd31   :  { %v755_v48 = vpack.c.bf16 %v1606_v47, %v1606_v47 }
 0xd33   :  { %757 = vrot.lane.b32.xlu0 %v755_v48, %s1369_s1 }
 0xda5   :  { %v758_v49 = vpop.permute.xlu0 %757 }
 0xda6   :  { %1274 = vmatmul.mubr.msk.bf16.vlgmr.msra.gmra.mrb[20].mxu1 %vm67_vm2, %v758_v49 }
 0xda7   :  { %1286 = vmatpush3.bf16.msra.mxu1 %v1421_v2  ;;  %1289 = vmatprep.mubr.msk.bf16.mxu1 %vm1367_vm0, %v1366_v0 }
 0xda8   :  { %1287 = vmatprep.subr.bf16.mxu1 %v1366_v0 }
 0xdab   :  { %1288 = vmatpush3.bf16.msra.mxu1 %v1438_v4 }
 0xdac   :  { %1301 = vmatprep.subr.bf16.mxu1 %v1366_v0 }
 0xe79   :  { %v796_v54 = vpop.f32.mrb[20].mxu1 }
 0xe7a   :  { %v797_v55 = vadd.f32 %v1469_v14, %v796_v54  ;;  %v1275_v56 = vpop.f32.mrb[21].mxu1  ;;  %v1300_v54 = vpop.f32.mrb[31].mxu0 }
 0xe7b   :  { %v799_v57 = vpop.f32.mrb[22].mxu1 }
 0xe7c   :  { %810 = vrot.lane.b32.xlu1 %v797_v55, %s1368_s4  ;;  %v1276_v58 = vpop.f32.mrb[23].mxu1  ;;  %v802_v60 = vadd.f32 %v797_v55, %v750_v59 }
 0xe7e   :  { %v1121_v61 = vmul.f32 -1.442695, %v802_v60  ;;  %v1000_v60 = vadd.f32 %v999_v51, %v1479_v22 }
 0xe80   :  { %1348 = vpow2.f32 %v1121_v61 }
 0xe8a   :  { %v1349_v62 = vpop.eup %1348 }
 0xe8b   :  { %v806_v63 = vadd.f32 1.0, %v1349_v62 }
 0xe8d   :  { %1350 = vrcp.f32 %v806_v63 }
 0xe97   :  { %v1351_v5 = vpop.eup %1350 }
 0xe98   :  { %v820_v16 = vsub.f32 1.0, %v1351_v5  ;;  %v826_v18 = vmul.f32 %v1351_v5, %v1606_v47 }
 0xeee   :  { %v811_v6 = vpop.permute.xlu1 %810 }
 0xeef   :  { %v813_v7 = vmul.f32 %v1351_v5, %v811_v6 }
 0xef1   :  { %815 = vrot.lane.b32.xlu0 %v813_v7, %s1368_s4 }
 0xf63   :  { %v816_v8 = vpop.permute.xlu0 %815 }
 0xf64   :  { %v818_v9 = vadd.f32 %v816_v8, %v750_v59 }
 0xf66   :  { %1352 = vtanh.f32 %v818_v9 }
 0xf70   :  { %v1353_v10 = vpop.eup %1352 }
 0xf71   :  { %822 = vrot.lane.b32.xlu1 %v1353_v10, %s1369_s1 }
 0xfe3   :  { %v823_v17 = vpop.permute.xlu1 %822 }
 0xfe4   :  { %v825_v19 = vmul.f32 %v823_v17, %v820_v16 }
 0xfe6   :  { %v1633_v20 = vadd.f32 %v826_v18, %v825_v19 }
 0xfe8   :  { %v880_v21 = vpack.c.bf16 %v1633_v20, %v1633_v20 }
 0xfea   :  { %882 = vrot.lane.b32.xlu0 %v880_v21, %s1369_s1 }
0x105c   :  { %v883_v1 = vpop.permute.xlu0 %882 }
0x105d   :  { %1290 = vmatmul.mubr.msk.bf16.vlgmr.msra.gmra.mrb[24].mxu1 %vm67_vm2, %v883_v1 }
0x105e   :  { %1302 = vmatpush3.bf16.msra.mxu1 %v1421_v2  ;;  %1305 = vmatprep.mubr.msk.bf16.mxu1 %vm1367_vm0, %v1366_v0  ;;  %v875_v2 = vadd.f32 %v874_v3, %v1479_v22 }
0x105f   :  { %1303 = vmatprep.subr.bf16.mxu1 %v1366_v0 }
0x1062   :  { %1304 = vmatpush3.bf16.msra.mxu1 %v1438_v4 }
0x1130   :  { %v921_v26 = vpop.f32.mrb[24].mxu1 }
0x1131   :  { %v922_v27 = vadd.f32 %v1469_v14, %v921_v26  ;;  %v1291_v28 = vpop.f32.mrb[25].mxu1 }
0x1132   :  { %v924_v29 = vpop.f32.mrb[26].mxu1 }
0x1133   :  { %935 = vrot.lane.b32.xlu1 %v922_v27, %s1368_s4  ;;  %v1292_v30 = vpop.f32.mrb[27].mxu1  ;;  %v927_v31 = vadd.f32 %v922_v27, %v875_v2 }
0x1135   :  { %v1126_v32 = vmul.f32 -1.442695, %v927_v31 }
0x1137   :  { %1354 = vpow2.f32 %v1126_v32 }
0x1141   :  { %v1355_v0 = vpop.eup %1354 }
0x1142   :  { %v931_v33 = vadd.f32 1.0, %v1355_v0 }
0x1144   :  { %1356 = vrcp.f32 %v931_v33 }
0x114e   :  { %v1357_v4 = vpop.eup %1356 }
0x114f   :  { %v945_v42 = vsub.f32 1.0, %v1357_v4  ;;  %v951_v45 = vmul.f32 %v1357_v4, %v1633_v20 }
0x11a5   :  { %v936_v34 = vpop.permute.xlu1 %935 }
0x11a6   :  { %v938_v35 = vmul.f32 %v1357_v4, %v936_v34 }
0x11a8   :  { %940 = vrot.lane.b32.xlu0 %v938_v35, %s1368_s4 }
0x121a   :  { %v941_v36 = vpop.permute.xlu0 %940 }
0x121b   :  { %v943_v37 = vadd.f32 %v941_v36, %v875_v2 }
0x121d   :  { %1358 = vtanh.f32 %v943_v37 }
0x1227   :  { %v1359_v38 = vpop.eup %1358 }
0x1228   :  { %947 = vrot.lane.b32.xlu1 %v1359_v38, %s1369_s1 }
0x129a   :  { %v948_v44 = vpop.permute.xlu1 %947 }
0x129b   :  { %v950_v46 = vmul.f32 %v948_v44, %v945_v42 }
0x129d   :  { %v952_v48 = vadd.f32 %v951_v45, %v950_v46 }
0x129f   :  { %v1005_v49 = vpack.c.bf16 %v952_v48, %v952_v48 }
0x12a1   :  { %1007 = vrot.lane.b32.xlu0 %v1005_v49, %s1369_s1 }
0x1313   :  { %v1008_v50 = vpop.permute.xlu0 %1007 }
0x1314   :  { %1306 = vmatmul.mubr.msk.bf16.vlgmr.msra.gmra.mrb[28].mxu1 %vm67_vm2, %v1008_v50 }
0x13e7   :  { %v1046_v55 = vpop.f32.mrb[28].mxu1 }
0x13e8   :  { %v1047_v56 = vadd.f32 %v1469_v14, %v1046_v55  ;;  %v1307_v57 = vpop.f32.mrb[29].mxu1 }
0x13e9   :  { %v1049_v58 = vpop.f32.mrb[30].mxu1 }
0x13ea   :  { %1060 = vrot.lane.b32.xlu1 %v1047_v56, %s1368_s4  ;;  %v1308_v59 = vpop.f32.mrb[31].mxu1  ;;  %v1052_v61 = vadd.f32 %v1047_v56, %v1000_v60 }
0x13ec   :  { %v1131_v62 = vmul.f32 -1.442695, %v1052_v61 }
0x13ee   :  { %1360 = vpow2.f32 %v1131_v62 }
0x13f8   :  { %v1361_v63 = vpop.eup %1360 }
0x13f9   :  { %v1056_v5 = vadd.f32 1.0, %v1361_v63 }
0x13fb   :  { %1362 = vrcp.f32 %v1056_v5 }
0x1405   :  { %v1363_v6 = vpop.eup %1362 }
0x1406   :  { %v1070_v12 = vsub.f32 1.0, %v1363_v6  ;;  %v1076_v16 = vmul.f32 %v1363_v6, %v952_v48 }
0x145c   :  { %v1061_v7 = vpop.permute.xlu1 %1060 }
0x145d   :  { %v1063_v8 = vmul.f32 %v1363_v6, %v1061_v7 }
0x145f   :  { %1065 = vrot.lane.b32.xlu0 %v1063_v8, %s1368_s4 }
0x1463   :  { %204 = vrot.lane.b32.xlu0 %v1494_v41, %s1369_s1 }
0x1467   :  { %454 = vrot.lane.b32.xlu0 %v1550_v43, %s1369_s1 }
0x146b   :  { %704 = vrot.lane.b32.xlu0 %v1606_v47, %s1369_s1 }
0x146f   :  { %954 = vrot.lane.b32.xlu0 %v952_v48, %s1369_s1 }
0x14d1   :  { %v1066_v14 = vpop.permute.xlu0 %1065 }
0x14d2   :  { %v1068_v22 = vadd.f32 %v1066_v14, %v1000_v60 }
0x14d4   :  { %1364 = vtanh.f32 %v1068_v22 }
0x14d5   :  { %v205_v9 = vpop.permute.xlu0 %204 }
0x14d6   :  { %208 = vst.msk [vmem:[%s1715_s7] sm:$0xf] %vm32_vm1, %v205_v9 }
0x14d9   :  { %v455_v10 = vpop.permute.xlu0 %454 }
0x14da   :  { %1107 = vst.msk [vmem:[%s1715_s7 + $0x8] sm:$0xf] %vm32_vm1, %v455_v10 }
0x14dd   :  { %v705_v41 = vpop.permute.xlu0 %704 }
0x14de   :  { %v1365_v43 = vpop.eup %1364  ;;  %1117 = vst.msk [vmem:[%s1715_s7 + $0x10] sm:$0xf] %vm32_vm1, %v705_v41 }
0x14df   :  { %1072 = vrot.lane.b32.xlu1 %v1365_v43, %s1369_s1 }
0x14e1   :  { %v955_v47 = vpop.permute.xlu0 %954 }
0x14e2   :  { %1127 = vst.msk [vmem:[%s1715_s7 + $0x18] sm:$0xf] %vm32_vm1, %v955_v47 }
0x14e3   :  { %329 = vrot.lane.b32.xlu1 %v1522_v11, %s1369_s1 }
0x14e7   :  { %579 = vrot.lane.b32.xlu1 %v1578_v15, %s1369_s1 }
0x14eb   :  { %829 = vrot.lane.b32.xlu1 %v1633_v20, %s1369_s1 }
0x1551   :  { %v1073_v13 = vpop.permute.xlu1 %1072 }
0x1552   :  { %v1075_v17 = vmul.f32 %v1073_v13, %v1070_v12 }
0x1554   :  { %v1077_v18 = vadd.f32 %v1076_v16, %v1075_v17 }
0x1555   :  { %v330_v19 = vpop.permute.xlu1 %329 }
0x1556   :  { %1102 = vst.msk [vmem:[%s1715_s7 + $0x4] sm:$0xf] %vm32_vm1, %v330_v19  ;;  %1079 = vrot.lane.b32.xlu1 %v1077_v18, %s1369_s1 }
0x1559   :  { %v580_v11 = vpop.permute.xlu1 %579 }
0x155a   :  { %1112 = vst.msk [vmem:[%s1715_s7 + $0xc] sm:$0xf] %vm32_vm1, %v580_v11 }
0x155d   :  { %v830_v15 = vpop.permute.xlu1 %829 }
0x155e   :  { %1122 = vst.msk [vmem:[%s1715_s7 + $0x14] sm:$0xf] %vm32_vm1, %v830_v15 }
0x15c8   :  { %v1080_v20 = vpop.permute.xlu1 %1079 }
0x15c9   :  { %1132 = vst.msk [vmem:[%s1715_s7 + $0x1c] sm:$0xf] %vm32_vm1, %v1080_v20  ;;  %1084 = vst.msk [vmem:[#allocation2] sm:$0xf] %vm32_vm1, %v1080_v20 }

// kernel: encoder_decoder_forward.5
= control target key start
LH: loop header
LB: loop body
LE: loop exit
PB: predicated region body
PF: predicated region fallthrough
CT: control target
= control target key end

     0   :  { %v1333_v0 = vmov 0.0   ;;  %vm1334_vm0 = vmmov 0   ;;  %vm32_vm1 = vcmask 257024   ;;  %vm59_vm2 = vcmask 130048   ;;  %s1335_s10 = smov 64   ;;  %s1654_s4 = inlined_call_operand.vmem [shape: bf16[32,96], index: 4, kind: input, shape index: {}]   ;;  %s1655_s3 = inlined_call_operand.vmem [shape: bf16[16,96], index: 3, kind: input, shape index: {}]   ;;  %s1656_s0 = inlined_call_operand.vmem [shape: f32[8,4,16], index: 0, kind: input, shape index: {}]   ;;  %s1657_s2 = inlined_call_operand.vmem [shape: f32[4,32], index: 2, kind: input, shape index: {}]   ;;  %s1658_s6 = inlined_call_operand.vmem [shape: f32[1,96], index: 6, kind: input, shape index: {}]   ;;  %s1659_s1 = inlined_call_operand.vmem [shape: f32[4,96], index: 1, kind: input, shape index: {}]   ;;  %s1660_s5 = inlined_call_operand.vmem [shape: f32[1,96], index: 5, kind: input, shape index: {}]   ;;  %s1661_s7 = inlined_call_operand.vmem [shape: f32[8,4,32], index: 7, kind: output, shape index: {}]  }
   0x1   :  { %1171 = vmatprep.subr.bf16.mxu1 %v1333_v0  ;;  %v1382_v1 = vld [vmem:[%s1654_s4] sm:$0xff]   ;;  %1165 = vmatprep.subr.bf16.mxu0 %v1333_v0  ;;  %v1398_v3 = vld [vmem:[%s1654_s4 + $0x8] sm:$0xff]   ;;  %vm122_vm3 = vcmask 261120  }
   0x2   :  { %v1388_v2 = vld [vmem:[%s1655_s3] sm:$0xff]   ;;  %1167 = vmatprep.mubr.msk.bf16.mxu0 %vm1334_vm0, %v1333_v0  ;;  %1175 = vmatprep.mubr.msk.bf16.mxu1 %vm1334_vm0, %v1333_v0  ;;  %v1095_v63 = vld [vmem:[%s1656_s0 + $0x8] sm:$0xf] }
   0x3   :  { %1172 = vmatpush3.bf16.msra.mxu1 %v1382_v1  ;;  %1166 = vmatpush3.bf16.msra.mxu0 %v1388_v2  ;;  %v51_v4 = vld [vmem:[%s1656_s0] sm:$0xf]  ;;  %v1090_v33 = vld [vmem:[%s1656_s0 + $0x4] sm:$0xf] }
   0x4   :  { %1173 = vmatprep.subr.bf16.mxu1 %v1333_v0  ;;  %v31_v5 = vld [vmem:[%s1657_s2] sm:$0xf]  ;;  %v52_v6 = vpack.c.bf16 %v51_v4, %v51_v4  ;;  %1179 = vmatprep.subr.bf16.mxu0 %v1333_v0  ;;  %v204_v34 = vpack.c.bf16 %v1090_v33, %v1090_v33  ;;  %v329_v4 = vpack.c.bf16 %v1095_v63, %v1095_v63 }
   0x5   :  { %33 = vst.msk [vmem:[#allocation2] sm:$0xf] %vm32_vm1, %v31_v5  ;;  %v1427_v13 = vld [vmem:[%s1658_s6] ss:$0 sm:$0xff] }
   0x6   :  { %1168 = vmatmul.mubr.msk.bf16.vlgmr.msra.gmra.mrb[0].mxu0 %vm59_vm2, %v52_v6  ;;  %v40_v19 = vld [vmem:[%s1659_s1] sm:$0xf]  ;;  %s1336_s1 = smov 96  }
   0x7   :  { %1174 = vmatpush3.bf16.msra.mxu1 %v1398_v3  ;;  %1180 = vmatpush3.bf16.msra.mxu0 %v1388_v2  ;;  %v1082_v20 = vld [vmem:[%s1660_s5] ss:$0 sm:$0xff]  ;;  %s1337_s5 = smov 32  }
   0x8   :  { %1185 = vmatprep.subr.bf16.mxu1 %v1333_v0  ;;  %1181 = vmatprep.mubr.msk.bf16.mxu0 %vm1334_vm0, %v1333_v0  ;;  %v1437_v21 = vadd.f32 %v1082_v20, %v40_v19 }
   0x9   :  { %1193 = vmatprep.subr.bf16.mxu0 %v1333_v0 }
   0xc   :  { %v50_v7 = vld [vmem:[#allocation2] sm:$0xf] }
   0xd   :  { %v103_v8 = vpack.c.bf16 %v50_v7, %v50_v7 }
   0xe   :  { %1182 = vmatmul.mubr.msk.bf16.vlgmr.msra.gmra.mrb[4].mxu0 %vm59_vm2, %v204_v34  ;;  %v1100_v34 = vld [vmem:[%s1656_s0 + $0xc] sm:$0xf] }
   0xf   :  { %1176 = vmatmul.mubr.msk.bf16.vlgmr.msra.gmra.mrb[0].mxu1 %vm122_vm3, %v103_v8  ;;  %1194 = vmatpush3.bf16.msra.mxu0 %v1388_v2 }
  0x10   :  { %1186 = vmatpush3.bf16.msra.mxu1 %v1382_v1  ;;  %1189 = vmatprep.mubr.msk.bf16.mxu1 %vm1334_vm0, %v1333_v0 }
  0x11   :  { %1187 = vmatprep.subr.bf16.mxu1 %v1333_v0  ;;  %1195 = vmatprep.mubr.msk.bf16.mxu0 %vm1334_vm0, %v1333_v0 }
  0x12   :  { %1207 = vmatprep.subr.bf16.mxu0 %v1333_v0 }
  0x14   :  { %1188 = vmatpush3.bf16.msra.mxu1 %v1398_v3 }
  0x15   :  { %1199 = vmatprep.subr.bf16.mxu1 %v1333_v0 }
  0x16   :  { %1196 = vmatmul.mubr.msk.bf16.vlgmr.msra.gmra.mrb[8].mxu0 %vm59_vm2, %v329_v4  ;;  %v1105_v4 = vld [vmem:[%s1656_s0 + $0x10] sm:$0xf] }
  0x17   :  { %1208 = vmatpush3.bf16.msra.mxu0 %v1388_v2  ;;  %1209 = vmatprep.mubr.msk.bf16.mxu0 %vm1334_vm0, %v1333_v0 }
  0x18   :  { %1221 = vmatprep.subr.bf16.mxu0 %v1333_v0 }
  0xd9   :  { %v97_v9 = vpop.f32.mrb[0].mxu0 }
  0xda   :  { %v1169_v10 = vpop.f32.mrb[1].mxu0  ;;  %v98_v22 = vadd.f32 %v97_v9, %v1437_v21 }
  0xdb   :  { %v100_v11 = vpop.f32.mrb[2].mxu0 }
  0xdc   :  { %v1170_v12 = vpop.f32.mrb[3].mxu0 }
  0xe1   :  { %v242_v43 = vpop.f32.mrb[4].mxu0 }
  0xe2   :  { %v160_v14 = vpop.f32.mrb[0].mxu1  ;;  %v1183_v44 = vpop.f32.mrb[5].mxu0  ;;  %v243_v52 = vadd.f32 %v242_v43, %v1437_v21 }
  0xe3   :  { %v161_v15 = vadd.f32 %v1427_v13, %v160_v14  ;;  %v1177_v16 = vpop.f32.mrb[1].mxu1  ;;  %v245_v45 = vpop.f32.mrb[6].mxu0 }
  0xe4   :  { %v163_v17 = vpop.f32.mrb[2].mxu1  ;;  %v1184_v46 = vpop.f32.mrb[7].mxu0 }
  0xe5   :  { %174 = vrot.lane.b32.xlu0 %v161_v15, %s1335_s10  ;;  %v1178_v18 = vpop.f32.mrb[3].mxu1  ;;  %v166_v23 = vadd.f32 %v161_v15, %v98_v22 }
  0xe7   :  { %v1089_v24 = vmul.f32 -1.442695, %v166_v23 }
  0xe9   :  { %1285 = vpow2.f32 %v1089_v24  ;;  %v367_v12 = vpop.f32.mrb[8].mxu0 }
  0xea   :  { %v1197_v14 = vpop.f32.mrb[9].mxu0  ;;  %v368_v23 = vadd.f32 %v367_v12, %v1437_v21 }
  0xeb   :  { %v370_v15 = vpop.f32.mrb[10].mxu0 }
  0xec   :  { %v1198_v16 = vpop.f32.mrb[11].mxu0 }
  0xf3   :  { %v1286_v25 = vpop.eup %1285 }
  0xf4   :  { %v170_v26 = vadd.f32 1.0, %v1286_v25 }
  0xf6   :  { %1287 = vrcp.f32 %v170_v26 }
 0x100   :  { %v1288_v27 = vpop.eup %1287 }
 0x101   :  { %v184_v36 = vsub.f32 1.0, %v1288_v27 }
 0x157   :  { %v175_v28 = vpop.permute.xlu0 %174 }
 0x158   :  { %v177_v29 = vmul.f32 %v1288_v27, %v175_v28 }
 0x15a   :  { %179 = vrot.lane.b32.xlu0 %v177_v29, %s1335_s10 }
 0x1cc   :  { %v180_v30 = vpop.permute.xlu0 %179 }
 0x1cd   :  { %v182_v31 = vadd.f32 %v180_v30, %v98_v22 }
 0x1cf   :  { %1289 = vtanh.f32 %v182_v31 }
 0x1d9   :  { %v1290_v32 = vpop.eup %1289 }
 0x1da   :  { %186 = vrot.lane.b32.xlu1 %v1290_v32, %s1336_s1 }
 0x1de   :  { %191 = vrot.lane.b32.xlu1 %v50_v7, %s1337_s5 }
 0x24c   :  { %v187_v35 = vpop.permute.xlu1 %186 }
 0x24d   :  { %v189_v38 = vmul.f32 %v187_v35, %v184_v36  ;;  %v454_v35 = vpack.c.bf16 %v1100_v34, %v1100_v34 }
 0x24f   :  { %1210 = vmatmul.mubr.msk.bf16.vlgmr.msra.gmra.mrb[12].mxu0 %vm59_vm2, %v454_v35 }
 0x250   :  { %v192_v37 = vpop.permute.xlu1 %191  ;;  %1222 = vmatpush3.bf16.msra.mxu0 %v1388_v2  ;;  %1223 = vmatprep.mubr.msk.bf16.mxu0 %vm1334_vm0, %v1333_v0 }
 0x251   :  { %v194_v39 = vmul.f32 %v1288_v27, %v192_v37  ;;  %1235 = vmatprep.subr.bf16.mxu0 %v1333_v0 }
 0x253   :  { %v1450_v40 = vadd.f32 %v194_v39, %v189_v38 }
 0x255   :  { %v248_v41 = vpack.c.bf16 %v1450_v40, %v1450_v40 }
 0x257   :  { %250 = vrot.lane.b32.xlu0 %v248_v41, %s1336_s1 }
 0x2c9   :  { %v251_v42 = vpop.permute.xlu0 %250 }
 0x2ca   :  { %1190 = vmatmul.mubr.msk.bf16.vlgmr.msra.gmra.mrb[4].mxu1 %vm122_vm3, %v251_v42 }
 0x2cb   :  { %1200 = vmatpush3.bf16.msra.mxu1 %v1382_v1  ;;  %1203 = vmatprep.mubr.msk.bf16.mxu1 %vm1334_vm0, %v1333_v0 }
 0x2cc   :  { %1201 = vmatprep.subr.bf16.mxu1 %v1333_v0 }
 0x2cf   :  { %1202 = vmatpush3.bf16.msra.mxu1 %v1398_v3 }
 0x2d0   :  { %1213 = vmatprep.subr.bf16.mxu1 %v1333_v0 }
 0x322   :  { %v492_v44 = vpop.f32.mrb[12].mxu0 }
 0x323   :  { %v1211_v45 = vpop.f32.mrb[13].mxu0 }
 0x324   :  { %v495_v46 = vpop.f32.mrb[14].mxu0 }
 0x39d   :  { %v289_v47 = vpop.f32.mrb[4].mxu1 }
 0x39e   :  { %v290_v48 = vadd.f32 %v1427_v13, %v289_v47  ;;  %v1191_v49 = vpop.f32.mrb[5].mxu1  ;;  %v1212_v47 = vpop.f32.mrb[15].mxu0 }
 0x39f   :  { %v292_v50 = vpop.f32.mrb[6].mxu1 }
 0x3a0   :  { %303 = vrot.lane.b32.xlu1 %v290_v48, %s1335_s10  ;;  %v1192_v51 = vpop.f32.mrb[7].mxu1  ;;  %v295_v53 = vadd.f32 %v290_v48, %v243_v52 }
 0x3a2   :  { %v1093_v54 = vmul.f32 -1.442695, %v295_v53  ;;  %v493_v53 = vadd.f32 %v492_v44, %v1437_v21 }
 0x3a4   :  { %1291 = vpow2.f32 %v1093_v54 }
 0x3ae   :  { %v1292_v55 = vpop.eup %1291 }
 0x3af   :  { %v299_v56 = vadd.f32 1.0, %v1292_v55 }
 0x3b1   :  { %1293 = vrcp.f32 %v299_v56 }
 0x3bb   :  { %v1294_v57 = vpop.eup %1293 }
 0x3bc   :  { %v313_v5 = vsub.f32 1.0, %v1294_v57  ;;  %v319_v7 = vmul.f32 %v1294_v57, %v1450_v40 }
 0x412   :  { %v304_v58 = vpop.permute.xlu1 %303 }
 0x413   :  { %v306_v59 = vmul.f32 %v1294_v57, %v304_v58 }
 0x415   :  { %308 = vrot.lane.b32.xlu0 %v306_v59, %s1335_s10 }
 0x487   :  { %v309_v60 = vpop.permute.xlu0 %308 }
 0x488   :  { %v311_v61 = vadd.f32 %v309_v60, %v243_v52 }
 0x48a   :  { %1295 = vtanh.f32 %v311_v61 }
 0x494   :  { %v1296_v62 = vpop.eup %1295 }
 0x495   :  { %315 = vrot.lane.b32.xlu1 %v1296_v62, %s1336_s1 }
 0x507   :  { %v316_v6 = vpop.permute.xlu1 %315 }
 0x508   :  { %v318_v8 = vmul.f32 %v316_v6, %v313_v5  ;;  %v579_v5 = vpack.c.bf16 %v1105_v4, %v1105_v4 }
 0x50a   :  { %v1476_v9 = vadd.f32 %v319_v7, %v318_v8  ;;  %1224 = vmatmul.mubr.msk.bf16.vlgmr.msra.gmra.mrb[16].mxu0 %vm59_vm2, %v579_v5 }
 0x50b   :  { %1236 = vmatpush3.bf16.msra.mxu0 %v1388_v2  ;;  %1237 = vmatprep.mubr.msk.bf16.mxu0 %vm1334_vm0, %v1333_v0 }
 0x50c   :  { %v373_v10 = vpack.c.bf16 %v1476_v9, %v1476_v9  ;;  %1249 = vmatprep.subr.bf16.mxu0 %v1333_v0 }
 0x50e   :  { %375 = vrot.lane.b32.xlu0 %v373_v10, %s1336_s1 }
 0x580   :  { %v376_v11 = vpop.permute.xlu0 %375 }
 0x581   :  { %1204 = vmatmul.mubr.msk.bf16.vlgmr.msra.gmra.mrb[8].mxu1 %vm122_vm3, %v376_v11 }
 0x582   :  { %1214 = vmatpush3.bf16.msra.mxu1 %v1382_v1  ;;  %1217 = vmatprep.mubr.msk.bf16.mxu1 %vm1334_vm0, %v1333_v0 }
 0x583   :  { %1215 = vmatprep.subr.bf16.mxu1 %v1333_v0 }
 0x586   :  { %1216 = vmatpush3.bf16.msra.mxu1 %v1398_v3 }
 0x587   :  { %1227 = vmatprep.subr.bf16.mxu1 %v1333_v0 }
 0x5dd   :  { %v617_v15 = vpop.f32.mrb[16].mxu0 }
 0x5de   :  { %v1225_v16 = vpop.f32.mrb[17].mxu0 }
 0x654   :  { %v414_v17 = vpop.f32.mrb[8].mxu1 }
 0x655   :  { %v415_v18 = vadd.f32 %v1427_v13, %v414_v17  ;;  %v1205_v19 = vpop.f32.mrb[9].mxu1  ;;  %v620_v17 = vpop.f32.mrb[18].mxu0 }
 0x656   :  { %v417_v20 = vpop.f32.mrb[10].mxu1 }
 0x657   :  { %428 = vrot.lane.b32.xlu1 %v415_v18, %s1335_s10  ;;  %v1206_v22 = vpop.f32.mrb[11].mxu1  ;;  %v420_v24 = vadd.f32 %v415_v18, %v368_v23  ;;  %v1226_v18 = vpop.f32.mrb[19].mxu0 }
 0x659   :  { %v1098_v25 = vmul.f32 -1.442695, %v420_v24 }
 0x65b   :  { %1297 = vpow2.f32 %v1098_v25  ;;  %v618_v25 = vadd.f32 %v617_v15, %v1437_v21 }
 0x665   :  { %v1298_v26 = vpop.eup %1297 }
 0x666   :  { %v424_v27 = vadd.f32 1.0, %v1298_v26 }
 0x668   :  { %1299 = vrcp.f32 %v424_v27 }
 0x672   :  { %v1300_v28 = vpop.eup %1299 }
 0x673   :  { %v438_v36 = vsub.f32 1.0, %v1300_v28  ;;  %v444_v38 = vmul.f32 %v1300_v28, %v1476_v9 }
 0x6c9   :  { %v429_v29 = vpop.permute.xlu1 %428 }
 0x6ca   :  { %v431_v30 = vmul.f32 %v1300_v28, %v429_v29 }
 0x6cc   :  { %433 = vrot.lane.b32.xlu0 %v431_v30, %s1335_s10 }
 0x73e   :  { %v434_v31 = vpop.permute.xlu0 %433 }
 0x73f   :  { %v436_v32 = vadd.f32 %v434_v31, %v368_v23 }
 0x741   :  { %1301 = vtanh.f32 %v436_v32 }
 0x74b   :  { %v1302_v33 = vpop.eup %1301 }
 0x74c   :  { %440 = vrot.lane.b32.xlu1 %v1302_v33, %s1336_s1 }
 0x7be   :  { %v441_v37 = vpop.permute.xlu1 %440 }
 0x7bf   :  { %v443_v39 = vmul.f32 %v441_v37, %v438_v36  ;;  %v1110_v36 = vld [vmem:[%s1656_s0 + $0x14] sm:$0xf] }
 0x7c0   :  { %v704_v37 = vpack.c.bf16 %v1110_v36, %v1110_v36  ;;  %v1120_v36 = vld [vmem:[%s1656_s0 + $0x1c] sm:$0xf] }
 0x7c1   :  { %v1502_v41 = vadd.f32 %v444_v38, %v443_v39 }
 0x7c2   :  { %1238 = vmatmul.mubr.msk.bf16.vlgmr.msra.gmra.mrb[20].mxu0 %vm59_vm2, %v704_v37  ;;  %v954_v37 = vpack.c.bf16 %v1120_v36, %v1120_v36 }
 0x7c3   :  { %v498_v42 = vpack.c.bf16 %v1502_v41, %v1502_v41  ;;  %1250 = vmatpush3.bf16.msra.mxu0 %v1388_v2  ;;  %1251 = vmatprep.mubr.msk.bf16.mxu0 %vm1334_vm0, %v1333_v0 }
 0x7c4   :  { %1263 = vmatprep.subr.bf16.mxu0 %v1333_v0 }
 0x7c5   :  { %500 = vrot.lane.b32.xlu0 %v498_v42, %s1336_s1 }
 0x837   :  { %v501_v43 = vpop.permute.xlu0 %500 }
 0x838   :  { %1218 = vmatmul.mubr.msk.bf16.vlgmr.msra.gmra.mrb[12].mxu1 %vm122_vm3, %v501_v43 }
 0x839   :  { %1228 = vmatpush3.bf16.msra.mxu1 %v1382_v1  ;;  %1231 = vmatprep.mubr.msk.bf16.mxu1 %vm1334_vm0, %v1333_v0 }
 0x83a   :  { %1229 = vmatprep.subr.bf16.mxu1 %v1333_v0 }
 0x83d   :  { %1230 = vmatpush3.bf16.msra.mxu1 %v1398_v3 }
 0x83e   :  { %1241 = vmatprep.subr.bf16.mxu1 %v1333_v0 }
 0x895   :  { %v742_v47 = vpop.f32.mrb[20].mxu0 }
 0x90b   :  { %v539_v48 = vpop.f32.mrb[12].mxu1 }
 0x90c   :  { %v540_v49 = vadd.f32 %v1427_v13, %v539_v48  ;;  %v1219_v50 = vpop.f32.mrb[13].mxu1  ;;  %v1239_v48 = vpop.f32.mrb[21].mxu0 }
 0x90d   :  { %v542_v51 = vpop.f32.mrb[14].mxu1 }
 0x90e   :  { %553 = vrot.lane.b32.xlu1 %v540_v49, %s1335_s10  ;;  %v1220_v52 = vpop.f32.mrb[15].mxu1  ;;  %v545_v54 = vadd.f32 %v540_v49, %v493_v53  ;;  %v745_v49 = vpop.f32.mrb[22].mxu0 }
 0x90f   :  { %v1240_v50 = vpop.f32.mrb[23].mxu0 }
 0x910   :  { %v1103_v55 = vmul.f32 -1.442695, %v545_v54 }
 0x912   :  { %1303 = vpow2.f32 %v1103_v55 }
 0x91c   :  { %v1304_v56 = vpop.eup %1303 }
 0x91d   :  { %v549_v57 = vadd.f32 1.0, %v1304_v56  ;;  %v743_v56 = vadd.f32 %v742_v47, %v1437_v21 }
 0x91f   :  { %1305 = vrcp.f32 %v549_v57 }
 0x929   :  { %v1306_v58 = vpop.eup %1305 }
 0x92a   :  { %v563_v6 = vsub.f32 1.0, %v1306_v58  ;;  %v569_v8 = vmul.f32 %v1306_v58, %v1502_v41 }
 0x980   :  { %v554_v59 = vpop.permute.xlu1 %553 }
 0x981   :  { %v556_v60 = vmul.f32 %v1306_v58, %v554_v59 }
 0x983   :  { %558 = vrot.lane.b32.xlu0 %v556_v60, %s1335_s10 }
 0x9f5   :  { %v559_v61 = vpop.permute.xlu0 %558 }
 0x9f6   :  { %v561_v62 = vadd.f32 %v559_v61, %v493_v53 }
 0x9f8   :  { %1307 = vtanh.f32 %v561_v62 }
 0xa02   :  { %v1308_v63 = vpop.eup %1307 }
 0xa03   :  { %565 = vrot.lane.b32.xlu1 %v1308_v63, %s1336_s1 }
 0xa75   :  { %v566_v7 = vpop.permute.xlu1 %565 }
 0xa76   :  { %v568_v10 = vmul.f32 %v566_v7, %v563_v6  ;;  %v1115_v7 = vld [vmem:[%s1656_s0 + $0x18] sm:$0xf] }
 0xa78   :  { %v1528_v11 = vadd.f32 %v569_v8, %v568_v10  ;;  %v829_v8 = vpack.c.bf16 %v1115_v7, %v1115_v7 }
 0xa7a   :  { %v623_v12 = vpack.c.bf16 %v1528_v11, %v1528_v11  ;;  %1252 = vmatmul.mubr.msk.bf16.vlgmr.msra.gmra.mrb[24].mxu0 %vm59_vm2, %v829_v8 }
 0xa7b   :  { %1264 = vmatpush3.bf16.msra.mxu0 %v1388_v2  ;;  %1265 = vmatprep.mubr.msk.bf16.mxu0 %vm1334_vm0, %v1333_v0 }
 0xa7c   :  { %625 = vrot.lane.b32.xlu0 %v623_v12, %s1336_s1 }
 0xa82   :  { %1266 = vmatmul.mubr.msk.bf16.vlgmr.msra.gmra.mrb[28].mxu0 %vm59_vm2, %v954_v37 }
 0xaee   :  { %v626_v14 = vpop.permute.xlu0 %625 }
 0xaef   :  { %1232 = vmatmul.mubr.msk.bf16.vlgmr.msra.gmra.mrb[16].mxu1 %vm122_vm3, %v626_v14 }
 0xaf0   :  { %1242 = vmatpush3.bf16.msra.mxu1 %v1382_v1  ;;  %1245 = vmatprep.mubr.msk.bf16.mxu1 %vm1334_vm0, %v1333_v0 }
 0xaf1   :  { %1243 = vmatprep.subr.bf16.mxu1 %v1333_v0 }
 0xaf4   :  { %1244 = vmatpush3.bf16.msra.mxu1 %v1398_v3 }
 0xaf5   :  { %1255 = vmatprep.subr.bf16.mxu1 %v1333_v0 }
 0xb4d   :  { %v867_v2 = vpop.f32.mrb[24].mxu0 }
 0xbc2   :  { %v664_v19 = vpop.f32.mrb[16].mxu1 }
 0xbc3   :  { %v665_v20 = vadd.f32 %v1427_v13, %v664_v19  ;;  %v1233_v22 = vpop.f32.mrb[17].mxu1  ;;  %v1253_v19 = vpop.f32.mrb[25].mxu0 }
 0xbc4   :  { %v667_v23 = vpop.f32.mrb[18].mxu1 }
 0xbc5   :  { %678 = vrot.lane.b32.xlu1 %v665_v20, %s1335_s10  ;;  %v1234_v24 = vpop.f32.mrb[19].mxu1  ;;  %v670_v26 = vadd.f32 %v665_v20, %v618_v25  ;;  %v870_v20 = vpop.f32.mrb[26].mxu0 }
 0xbc6   :  { %v1254_v22 = vpop.f32.mrb[27].mxu0 }
 0xbc7   :  { %v1108_v27 = vmul.f32 -1.442695, %v670_v26  ;;  %v992_v48 = vpop.f32.mrb[28].mxu0 }
 0xbc8   :  { %v1267_v49 = vpop.f32.mrb[29].mxu0 }
 0xbc9   :  { %1309 = vpow2.f32 %v1108_v27  ;;  %v995_v50 = vpop.f32.mrb[30].mxu0 }
 0xbd3   :  { %v1310_v28 = vpop.eup %1309 }
 0xbd4   :  { %v674_v29 = vadd.f32 1.0, %v1310_v28 }
 0xbd6   :  { %1311 = vrcp.f32 %v674_v29 }
 0xbe0   :  { %v1312_v30 = vpop.eup %1311 }
 0xbe1   :  { %v688_v38 = vsub.f32 1.0, %v1312_v30  ;;  %v694_v42 = vmul.f32 %v1312_v30, %v1528_v11 }
 0xc37   :  { %v679_v31 = vpop.permute.xlu1 %678 }
 0xc38   :  { %v681_v32 = vmul.f32 %v1312_v30, %v679_v31 }
 0xc3a   :  { %683 = vrot.lane.b32.xlu0 %v681_v32, %s1335_s10 }
 0xcac   :  { %v684_v33 = vpop.permute.xlu0 %683 }
 0xcad   :  { %v686_v34 = vadd.f32 %v684_v33, %v618_v25 }
 0xcaf   :  { %1313 = vtanh.f32 %v686_v34 }
 0xcb9   :  { %v1314_v35 = vpop.eup %1313 }
 0xcba   :  { %690 = vrot.lane.b32.xlu1 %v1314_v35, %s1336_s1 }
 0xd2c   :  { %v691_v39 = vpop.permute.xlu1 %690 }
 0xd2d   :  { %v693_v43 = vmul.f32 %v691_v39, %v688_v38 }
 0xd2f   :  { %v1554_v44 = vadd.f32 %v694_v42, %v693_v43 }
 0xd31   :  { %v748_v45 = vpack.c.bf16 %v1554_v44, %v1554_v44 }
 0xd33   :  { %750 = vrot.lane.b32.xlu0 %v748_v45, %s1336_s1 }
 0xda5   :  { %v751_v46 = vpop.permute.xlu0 %750 }
 0xda6   :  { %1246 = vmatmul.mubr.msk.bf16.vlgmr.msra.gmra.mrb[20].mxu1 %vm122_vm3, %v751_v46 }
 0xda7   :  { %1256 = vmatpush3.bf16.msra.mxu1 %v1382_v1  ;;  %1259 = vmatprep.mubr.msk.bf16.mxu1 %vm1334_vm0, %v1333_v0 }
 0xda8   :  { %1257 = vmatprep.subr.bf16.mxu1 %v1333_v0 }
 0xdab   :  { %1258 = vmatpush3.bf16.msra.mxu1 %v1398_v3 }
 0xdac   :  { %1269 = vmatprep.subr.bf16.mxu1 %v1333_v0 }
 0xe79   :  { %v789_v51 = vpop.f32.mrb[20].mxu1 }
 0xe7a   :  { %v790_v52 = vadd.f32 %v1427_v13, %v789_v51  ;;  %v1247_v53 = vpop.f32.mrb[21].mxu1  ;;  %v1268_v51 = vpop.f32.mrb[31].mxu0 }
 0xe7b   :  { %v792_v54 = vpop.f32.mrb[22].mxu1 }
 0xe7c   :  { %803 = vrot.lane.b32.xlu1 %v790_v52, %s1335_s10  ;;  %v1248_v55 = vpop.f32.mrb[23].mxu1  ;;  %v795_v57 = vadd.f32 %v790_v52, %v743_v56 }
 0xe7e   :  { %v1113_v58 = vmul.f32 -1.442695, %v795_v57  ;;  %v993_v57 = vadd.f32 %v992_v48, %v1437_v21 }
 0xe80   :  { %1315 = vpow2.f32 %v1113_v58 }
 0xe8a   :  { %v1316_v59 = vpop.eup %1315 }
 0xe8b   :  { %v799_v60 = vadd.f32 1.0, %v1316_v59 }
 0xe8d   :  { %1317 = vrcp.f32 %v799_v60 }
 0xe97   :  { %v1318_v61 = vpop.eup %1317 }
 0xe98   :  { %v813_v10 = vsub.f32 1.0, %v1318_v61  ;;  %v819_v14 = vmul.f32 %v1318_v61, %v1554_v44 }
 0xeee   :  { %v804_v62 = vpop.permute.xlu1 %803 }
 0xeef   :  { %v806_v63 = vmul.f32 %v1318_v61, %v804_v62 }
 0xef1   :  { %808 = vrot.lane.b32.xlu0 %v806_v63, %s1335_s10 }
 0xf63   :  { %v809_v4 = vpop.permute.xlu0 %808 }
 0xf64   :  { %v811_v5 = vadd.f32 %v809_v4, %v743_v56 }
 0xf66   :  { %1319 = vtanh.f32 %v811_v5 }
 0xf70   :  { %v1320_v6 = vpop.eup %1319 }
 0xf71   :  { %815 = vrot.lane.b32.xlu1 %v1320_v6, %s1336_s1 }
 0xfe3   :  { %v816_v12 = vpop.permute.xlu1 %815 }
 0xfe4   :  { %v818_v15 = vmul.f32 %v816_v12, %v813_v10 }
 0xfe6   :  { %v1579_v16 = vadd.f32 %v819_v14, %v818_v15 }
 0xfe8   :  { %v873_v17 = vpack.c.bf16 %v1579_v16, %v1579_v16 }
 0xfea   :  { %875 = vrot.lane.b32.xlu0 %v873_v17, %s1336_s1 }
0x105c   :  { %v876_v18 = vpop.permute.xlu0 %875 }
0x105d   :  { %1260 = vmatmul.mubr.msk.bf16.vlgmr.msra.gmra.mrb[24].mxu1 %vm122_vm3, %v876_v18 }
0x105e   :  { %1270 = vmatpush3.bf16.msra.mxu1 %v1382_v1  ;;  %1273 = vmatprep.mubr.msk.bf16.mxu1 %vm1334_vm0, %v1333_v0  ;;  %v868_v1 = vadd.f32 %v867_v2, %v1437_v21 }
0x105f   :  { %1271 = vmatprep.subr.bf16.mxu1 %v1333_v0 }
0x1062   :  { %1272 = vmatpush3.bf16.msra.mxu1 %v1398_v3 }
0x1130   :  { %v914_v23 = vpop.f32.mrb[24].mxu1 }
0x1131   :  { %v915_v24 = vadd.f32 %v1427_v13, %v914_v23  ;;  %v1261_v25 = vpop.f32.mrb[25].mxu1 }
0x1132   :  { %v917_v26 = vpop.f32.mrb[26].mxu1 }
0x1133   :  { %928 = vrot.lane.b32.xlu1 %v915_v24, %s1335_s10  ;;  %v1262_v27 = vpop.f32.mrb[27].mxu1  ;;  %v920_v28 = vadd.f32 %v915_v24, %v868_v1 }
0x1135   :  { %v1118_v29 = vmul.f32 -1.442695, %v920_v28 }
0x1137   :  { %1321 = vpow2.f32 %v1118_v29 }
0x1141   :  { %v1322_v0 = vpop.eup %1321 }
0x1142   :  { %v924_v30 = vadd.f32 1.0, %v1322_v0 }
0x1144   :  { %1323 = vrcp.f32 %v924_v30 }
0x114e   :  { %v1324_v3 = vpop.eup %1323 }
0x114f   :  { %v938_v38 = vsub.f32 1.0, %v1324_v3  ;;  %v944_v42 = vmul.f32 %v1324_v3, %v1579_v16 }
0x11a5   :  { %v929_v31 = vpop.permute.xlu1 %928 }
0x11a6   :  { %v931_v32 = vmul.f32 %v1324_v3, %v929_v31 }
0x11a8   :  { %933 = vrot.lane.b32.xlu0 %v931_v32, %s1335_s10 }
0x121a   :  { %v934_v33 = vpop.permute.xlu0 %933 }
0x121b   :  { %v936_v34 = vadd.f32 %v934_v33, %v868_v1 }
0x121d   :  { %1325 = vtanh.f32 %v936_v34 }
0x1227   :  { %v1326_v35 = vpop.eup %1325 }
0x1228   :  { %940 = vrot.lane.b32.xlu1 %v1326_v35, %s1336_s1 }
0x129a   :  { %v941_v39 = vpop.permute.xlu1 %940 }
0x129b   :  { %v943_v43 = vmul.f32 %v941_v39, %v938_v38 }
0x129d   :  { %v945_v45 = vadd.f32 %v944_v42, %v943_v43 }
0x129f   :  { %v998_v46 = vpack.c.bf16 %v945_v45, %v945_v45 }
0x12a1   :  { %1000 = vrot.lane.b32.xlu0 %v998_v46, %s1336_s1 }
0x1313   :  { %v1001_v47 = vpop.permute.xlu0 %1000 }
0x1314   :  { %1274 = vmatmul.mubr.msk.bf16.vlgmr.msra.gmra.mrb[28].mxu1 %vm122_vm3, %v1001_v47 }
0x13e7   :  { %v1039_v52 = vpop.f32.mrb[28].mxu1 }
0x13e8   :  { %v1040_v53 = vadd.f32 %v1427_v13, %v1039_v52  ;;  %v1275_v54 = vpop.f32.mrb[29].mxu1 }
0x13e9   :  { %v1042_v55 = vpop.f32.mrb[30].mxu1 }
0x13ea   :  { %1053 = vrot.lane.b32.xlu1 %v1040_v53, %s1335_s10  ;;  %v1276_v56 = vpop.f32.mrb[31].mxu1  ;;  %v1045_v58 = vadd.f32 %v1040_v53, %v993_v57 }
0x13ec   :  { %v1123_v59 = vmul.f32 -1.442695, %v1045_v58 }
0x13ee   :  { %1327 = vpow2.f32 %v1123_v59 }
0x13f8   :  { %v1328_v60 = vpop.eup %1327 }
0x13f9   :  { %v1049_v61 = vadd.f32 1.0, %v1328_v60 }
0x13fb   :  { %1329 = vrcp.f32 %v1049_v61 }
0x1405   :  { %v1330_v62 = vpop.eup %1329 }
0x1406   :  { %v1063_v7 = vsub.f32 1.0, %v1330_v62  ;;  %v1069_v10 = vmul.f32 %v1330_v62, %v945_v45 }
0x145c   :  { %v1054_v63 = vpop.permute.xlu1 %1053 }
0x145d   :  { %v1056_v4 = vmul.f32 %v1330_v62, %v1054_v63 }
0x145f   :  { %1058 = vrot.lane.b32.xlu0 %v1056_v4, %s1335_s10 }
0x1463   :  { %197 = vrot.lane.b32.xlu0 %v1450_v40, %s1336_s1 }
0x1467   :  { %447 = vrot.lane.b32.xlu0 %v1502_v41, %s1336_s1 }
0x146b   :  { %697 = vrot.lane.b32.xlu0 %v1554_v44, %s1336_s1 }
0x146f   :  { %947 = vrot.lane.b32.xlu0 %v945_v45, %s1336_s1 }
0x14d1   :  { %v1059_v13 = vpop.permute.xlu0 %1058 }
0x14d2   :  { %v1061_v21 = vadd.f32 %v1059_v13, %v993_v57 }
0x14d4   :  { %1331 = vtanh.f32 %v1061_v21 }
0x14d5   :  { %v198_v5 = vpop.permute.xlu0 %197 }
0x14d6   :  { %201 = vst.msk [vmem:[%s1661_s7] sm:$0xf] %vm32_vm1, %v198_v5 }
0x14d9   :  { %v448_v6 = vpop.permute.xlu0 %447 }
0x14da   :  { %1099 = vst.msk [vmem:[%s1661_s7 + $0x8] sm:$0xf] %vm32_vm1, %v448_v6 }
0x14dd   :  { %v698_v40 = vpop.permute.xlu0 %697 }
0x14de   :  { %v1332_v41 = vpop.eup %1331  ;;  %1109 = vst.msk [vmem:[%s1661_s7 + $0x10] sm:$0xf] %vm32_vm1, %v698_v40 }
0x14df   :  { %1065 = vrot.lane.b32.xlu1 %v1332_v41, %s1336_s1 }
0x14e1   :  { %v948_v44 = vpop.permute.xlu0 %947 }
0x14e2   :  { %1119 = vst.msk [vmem:[%s1661_s7 + $0x18] sm:$0xf] %vm32_vm1, %v948_v44 }
0x14e3   :  { %322 = vrot.lane.b32.xlu1 %v1476_v9, %s1336_s1 }
0x14e7   :  { %572 = vrot.lane.b32.xlu1 %v1528_v11, %s1336_s1 }
0x14eb   :  { %822 = vrot.lane.b32.xlu1 %v1579_v16, %s1336_s1 }
0x1551   :  { %v1066_v8 = vpop.permute.xlu1 %1065 }
0x1552   :  { %v1068_v12 = vmul.f32 %v1066_v8, %v1063_v7 }
0x1554   :  { %v1070_v14 = vadd.f32 %v1069_v10, %v1068_v12 }
0x1555   :  { %v323_v15 = vpop.permute.xlu1 %322 }
0x1556   :  { %1094 = vst.msk [vmem:[%s1661_s7 + $0x4] sm:$0xf] %vm32_vm1, %v323_v15  ;;  %1072 = vrot.lane.b32.xlu1 %v1070_v14, %s1336_s1 }
0x1559   :  { %v573_v9 = vpop.permute.xlu1 %572 }
0x155a   :  { %1104 = vst.msk [vmem:[%s1661_s7 + $0xc] sm:$0xf] %vm32_vm1, %v573_v9 }
0x155d   :  { %v823_v11 = vpop.permute.xlu1 %822 }
0x155e   :  { %1114 = vst.msk [vmem:[%s1661_s7 + $0x14] sm:$0xf] %vm32_vm1, %v823_v11 }
0x15c8   :  { %v1073_v16 = vpop.permute.xlu1 %1072 }
0x15c9   :  { %1124 = vst.msk [vmem:[%s1661_s7 + $0x1c] sm:$0xf] %vm32_vm1, %v1073_v16  ;;  %1077 = vst.msk [vmem:[#allocation2] sm:$0xf] %vm32_vm1, %v1073_v16 }

</bundles_post_ra>
